<compile_context>
chip_gen: v7x
topology: tpu7x:2x2x1
jax: 0.10.0
libtpu: 0.0.40
codegen_flags: <defaults>
</compile_context>

<pallas_src>
import numpy as np
import jax
import jax.numpy as jnp
from jax.experimental import pallas as pl
from jax.experimental.pallas import tpu as pltpu

INPUT_DIM = 47                     # 20 (id embedding) + 6 (locale) + 21 (price)
OUTPUT_DIM = 2
EMBED_DIM = 20
NUM_FEAT = INPUT_DIM - EMBED_DIM   # 27 numeric feature columns
RAW_FEATS = 1 + NUM_FEAT           # 28 columns in the raw input
PROJ_PAD = 128                     # 128-lane padded width of each q/k/v projection
SLAB_W = 3 * PROJ_PAD              # fused [q | k | v] projection slab width

# Lane-padded VMEM footprint per batch row (f32, S=8):
#   emb + feat input blocks (double-buffered)     ~16 KiB
#   fused projection (TB,S,384) + q/k/v views     ~12 KiB
#   broadcast temps for q.k and p.v               ~8 KiB
#   misc (TB,128) intermediates, seq_len, output  ~4 KiB
BYTES_PER_ROW = 40 * 1024


def _sigmoid(z):
    return 1.0 / (1.0 + jnp.exp(-z))


def _model_kernel(emb_ref, feat_ref, slen_ref,
                  w_emb_ref, w_ft_ref, b_proj_ref,
                  se_prev_w_ref, se_ne_w_ref, se_nf_w_ref, se1_b_ref,
                  se2_w_ref, se2_b_ref,
                  gsel_prev_ref, gsel_nf_ref,
                  fc1a_ref, fc1ne_ref, fc1nf_ref, fc1_b_ref,
                  fc2_w_ref, fc2_b_ref, fc3_w_ref, fc3_b_ref,
                  fc4d_w_ref, fc4d_b_ref,
                  out_ref):
    emb = emb_ref[...]            # (TB, S, 20) f32  id embeddings
    feat = feat_ref[...]          # (TB, S, 27) f32  numeric feats
    slen = slen_ref[...]          # (TB, 1)     int32 sequence lengths
    TB, S, E = emb.shape
    F = feat.shape[2]

    # ---------------- sequence bookkeeping (int32 compares) ----------------
    pos = jax.lax.broadcasted_iota(jnp.int32, (TB, S), 1)                 # (TB, S)
    q_onehot3 = (jax.lax.broadcasted_iota(jnp.int32, (TB, S, 1), 1)
                 == (slen - 1)[:, :, None]).astype(jnp.float32)           # (TB, S, 1)
    valid_b = pos < (slen - 1)                                            # key positions
    valid = valid_b.astype(jnp.float32)

    # ---------------- AttentionLayerWithMask (fused Q|K|V projection) ----------------
    emb2 = emb.reshape(TB * S, E)
    ft2 = feat.reshape(TB * S, F)
    proj = (jnp.dot(emb2, w_emb_ref[...], preferred_element_type=jnp.float32)
            + jnp.dot(ft2, w_ft_ref[...], preferred_element_type=jnp.float32)
            + b_proj_ref[...])                                            # (TB*S, 384)
    proj = proj.reshape(TB, S, SLAB_W)
    qp = proj[:, :, 0:PROJ_PAD]                  # (TB, S, 128), lanes 47.. are exact 0
    kp = proj[:, :, PROJ_PAD:2 * PROJ_PAD]
    vp = proj[:, :, 2 * PROJ_PAD:3 * PROJ_PAD]

    # query = projected row at position seq_len-1 (single sublane reduction)
    q = jnp.sum(q_onehot3 * qp, axis=1)                                   # (TB, 128)

    # S=8 / 128-lane contractions: broadcast+reduce (VPU/XLU); MXU tiles would be
    # mostly padding at these shapes.  Zero-padded lanes contribute exactly 0.
    scores = jnp.sum(q[:, None, :] * kp, axis=2)                          # (TB, S)
    scores_m = jnp.where(valid_b, scores, -1e30)
    s_max = jnp.max(scores_m, axis=1, keepdims=True)
    e = jnp.exp(scores_m - s_max) * valid
    # NOTE: when seq_len == 1 the softmax is empty; the clamp below yields attn = 0
    # (reference / torch would produce NaN) -- intentional, documented divergence.
    # NOTE: approx reciprocal => attention weights sum to ~1 (not bit-exact).
    denom = jnp.maximum(jnp.sum(e, axis=1, keepdims=True), 1e-30)
    p = e * pl.reciprocal(denom, approx=True)
    attn = jnp.sum(p[:, :, None] * vp, axis=1)                            # (TB, 128)
    prev_items = jnp.tanh(attn)                                           # dropout = identity

    next_emb = emb[:, S - 1, :]                                           # (TB, 20)
    next_ft = feat[:, S - 1, :]                                           # (TB, 27)

    # ---------------- SENet (means & gates folded into small matmuls) ----------------
    h = (jnp.dot(prev_items, se_prev_w_ref[...], preferred_element_type=jnp.float32)
         + jnp.dot(next_emb, se_ne_w_ref[...], preferred_element_type=jnp.float32)
         + jnp.dot(next_ft, se_nf_w_ref[...], preferred_element_type=jnp.float32)
         + se1_b_ref[...])                                                # (TB, 2)
    h = jnp.maximum(h, 0.0)
    w6 = _sigmoid(jnp.dot(h, se2_w_ref[...], preferred_element_type=jnp.float32)
                  + se2_b_ref[...])                                       # (TB, 6)

    se_prev = prev_items * jnp.dot(w6[:, 0:3], gsel_prev_ref[...],
                                   preferred_element_type=jnp.float32)    # (TB, 128)
    se_next_emb = next_emb * w6[:, 3:4]                                   # (TB, 20)
    se_next_ft = next_ft * jnp.dot(w6[:, 4:6], gsel_nf_ref[...],
                                   preferred_element_type=jnp.float32)    # (TB, 27)
    # dropout = identity

    # ---------------- MLP head ----------------
    h1 = (jnp.dot(se_prev, fc1a_ref[...], preferred_element_type=jnp.float32)
          + jnp.dot(se_next_emb, fc1ne_ref[...], preferred_element_type=jnp.float32)
          + jnp.dot(se_next_ft, fc1nf_ref[...], preferred_element_type=jnp.float32)
          + fc1_b_ref[...])
    h1 = jnp.maximum(h1, 0.0)                                             # (TB, 47)
    h2 = jnp.maximum(jnp.dot(h1, fc2_w_ref[...], preferred_element_type=jnp.float32)
                     + fc2_b_ref[...], 0.0)                               # (TB, 23)
    h3 = jnp.maximum(jnp.dot(h2, fc3_w_ref[...], preferred_element_type=jnp.float32)
                     + fc3_b_ref[...], 0.0)                               # (TB, 11)

    # 2-class softmax == sigmoid of logit differences: no cross-lane max/sum needed.
    diff = (jnp.dot(h3, fc4d_w_ref[...], preferred_element_type=jnp.float32)
            + fc4d_b_ref[...])                                            # (TB, 2)
    out_ref[...] = _sigmoid(diff)


def _round_up(x, m):
    return ((x + m - 1) // m) * m


def _const_spec(shape):
    nd = len(shape)
    return pl.BlockSpec(tuple(shape), lambda i, _nd=nd: (0,) * _nd)


def _pick_tiling(B):
    """Generation-aware batch tile & VMEM limit."""
    vmem_cap = 128 * 1024 * 1024
    try:
        info = pltpu.get_tpu_info()
        vmem_cap = int(getattr(info, "vmem_capacity_bytes", vmem_cap))
    except Exception:
        pass
    if vmem_cap <= 64 * 1024 * 1024:
        # v7x-class: 64 MiB physical VMEM, 2 TensorCores -> want >= 4 grid steps.
        vmem_limit = 40 * 1024 * 1024
        budget = 16 * 1024 * 1024
        min_grid = 4
    else:
        # v5e / v6e: 128 MiB physical VMEM, single TensorCore.
        vmem_limit = 64 * 1024 * 1024
        budget = 24 * 1024 * 1024
        min_grid = 2
    tile_b = max(8, min(512, (budget // BYTES_PER_ROW) // 8 * 8))
    # keep at least `min_grid` grid steps (DMA/compute overlap, megacore sharding)
    grid_cap = max(8, _round_up(-(-B // min_grid), 8))
    tile_b = min(tile_b, grid_cap)
    b_pad = _round_up(B, tile_b)
    return tile_b, b_pad, vmem_limit


def model_forward(params, x_raw, mask):
    # ---- glue (plain JAX): vocab embedding gather; keep id-emb / numeric feats separate
    ids = x_raw[:, :, 0].astype(jnp.int32)
    emb = jnp.take(params['embed'], ids, axis=0)                 # (B, S, 20)
    feat = x_raw[:, :, 1:]                                       # (B, S, 27)
    seq_len = jnp.sum(mask.astype(jnp.float32), axis=1, keepdims=True).astype(jnp.int32)  # (B,1)
    B, S = mask.shape

    tile_b, b_pad, vmem_limit = _pick_tiling(B)
    if b_pad != B:
        pad = b_pad - B
        emb = jnp.pad(emb, ((0, pad), (0, 0), (0, 0)))
        feat = jnp.pad(feat, ((0, pad), (0, 0), (0, 0)))
        seq_len = jnp.pad(seq_len, ((0, pad), (0, 0)))           # padded rows: seq_len = 0

    # ---- weight plumbing (tiny, done once outside the kernel) ----
    # fused [Wq | Wk | Wv] projection slab, each zero-padded 47 -> 128 lanes
    def _place(dst, col0, w):
        return dst.at[:, col0:col0 + INPUT_DIM].set(w)

    w_emb = jnp.zeros((EMBED_DIM, SLAB_W), jnp.float32)
    w_ft = jnp.zeros((NUM_FEAT, SLAB_W), jnp.float32)
    b_proj = jnp.zeros((1, SLAB_W), jnp.float32)
    for j, name in enumerate(('q', 'k', 'v')):
        w = params['w' + name]
        w_emb = _place(w_emb, j * PROJ_PAD, w[:EMBED_DIM])
        w_ft = _place(w_ft, j * PROJ_PAD, w[EMBED_DIM:])
        b_proj = _place(b_proj, j * PROJ_PAD, params['b' + name])

    # segment-mean selector matrices folded into the SE fc1 weight
    m_prev = np.zeros((INPUT_DIM, 3), np.float32)
    m_prev[0:20, 0] = 1.0 / 20.0
    m_prev[20:26, 1] = 1.0 / 6.0
    m_prev[26:47, 2] = 1.0 / 21.0
    m_ne = np.full((EMBED_DIM, 1), 1.0 / 20.0, np.float32)
    m_nf = np.zeros((NUM_FEAT, 2), np.float32)
    m_nf[0:6, 0] = 1.0 / 6.0
    m_nf[6:27, 1] = 1.0 / 21.0
    se_prev_w = jnp.zeros((PROJ_PAD, 2), jnp.float32).at[:INPUT_DIM].set(
        jnp.asarray(m_prev) @ params['se1_w'][0:3])              # (128, 2), rows 47.. = 0
    se_ne_w = jnp.asarray(m_ne) @ params['se1_w'][3:4]           # (20, 2)
    se_nf_w = jnp.asarray(m_nf) @ params['se1_w'][4:6]           # (27, 2)

    # gate-expansion selector matrices (prev path padded to 128 lanes)
    gsel_prev = np.zeros((3, PROJ_PAD), np.float32)
    gsel_prev[0, 0:20] = 1.0
    gsel_prev[1, 20:26] = 1.0
    gsel_prev[2, 26:47] = 1.0
    gsel_nf = np.zeros((2, NUM_FEAT), np.float32)
    gsel_nf[0, 0:6] = 1.0
    gsel_nf[1, 6:27] = 1.0

    fc1a = jnp.zeros((PROJ_PAD, INPUT_DIM), jnp.float32).at[:INPUT_DIM].set(
        params['fc1_w'][:INPUT_DIM])                             # prev rows, padded to 128
    fc1ne = params['fc1_w'][INPUT_DIM:INPUT_DIM + EMBED_DIM]     # next id rows
    fc1nf = params['fc1_w'][INPUT_DIM + EMBED_DIM:]              # next locale+price rows

    # fc4 folded into logit-difference form: softmax([a,b]) == sigmoid([a-b, b-a])
    w4 = params['fc4_w']                                         # (11, 2)
    b4 = params['fc4_b']                                         # (1, 2)
    fc4d_w = jnp.stack([w4[:, 0] - w4[:, 1], w4[:, 1] - w4[:, 0]], axis=1)
    fc4d_b = jnp.concatenate([b4[:, 0:1] - b4[:, 1:2], b4[:, 1:2] - b4[:, 0:1]], axis=1)

    args = (emb, feat, seq_len,
            w_emb, w_ft, b_proj,
            se_prev_w, se_ne_w, se_nf_w, params['se1_b'],
            params['se2_w'], params['se2_b'],
            jnp.asarray(gsel_prev), jnp.asarray(gsel_nf),
            fc1a, fc1ne, fc1nf, params['fc1_b'],
            params['fc2_w'], params['fc2_b'],
            params['fc3_w'], params['fc3_b'],
            fc4d_w, fc4d_b)

    in_specs = [
        pl.BlockSpec((tile_b, S, EMBED_DIM), lambda i: (i, 0, 0)),
        pl.BlockSpec((tile_b, S, NUM_FEAT), lambda i: (i, 0, 0)),
        pl.BlockSpec((tile_b, 1), lambda i: (i, 0)),
    ] + [_const_spec(a.shape) for a in args[3:]]

    out = pl.pallas_call(
        _model_kernel,
        out_shape=jax.ShapeDtypeStruct((b_pad, OUTPUT_DIM), jnp.float32),
        grid=(b_pad // tile_b,),
        in_specs=in_specs,
        out_specs=pl.BlockSpec((tile_b, OUTPUT_DIM), lambda i: (i, 0)),
        compiler_params=pltpu.CompilerParams(
            dimension_semantics=("parallel",),       # megacore sharding on v7x
            vmem_limit_bytes=vmem_limit),
    )(*args)
    return out[:B]


# ---------------- pure-JAX reference (for correctness check) ----------------
def reference_forward(params, x_raw, mask):
    hp = jax.lax.Precision.HIGHEST
    ids = x_raw[:, :, 0].astype(jnp.int32)
    emb = params['embed'][ids]
    x = jnp.concatenate([emb, x_raw[:, :, 1:]], axis=2)
    B, S, D = x.shape
    seq_len = np.asarray(jnp.sum(mask, axis=1)).astype(np.int32)
    rows = []
    for i in range(B):
        sl = int(seq_len[i])
        q = jnp.dot(x[i, sl - 1][None, :], params['wq'], precision=hp) + params['bq']
        k = jnp.dot(x[i, :sl - 1], params['wk'], precision=hp) + params['bk']
        v = jnp.dot(x[i, :sl - 1], params['wv'], precision=hp) + params['bv']
        s = jnp.dot(q, k.T, precision=hp)
        p = jax.nn.softmax(s, axis=-1)
        rows.append(jnp.tanh(jnp.dot(p, v, precision=hp)))
    prev = jnp.concatenate(rows, axis=0)
    nxt = x[:, -1, :]
    feat = jnp.concatenate([prev, nxt], axis=1)                       # (B, 94)
    seg = [(0, 20), (20, 26), (26, 47), (47, 67), (67, 73), (73, 94)]
    se_in = jnp.stack([jnp.mean(feat[:, a:b], axis=1) for a, b in seg], axis=1)
    h = jax.nn.relu(jnp.dot(se_in, params['se1_w'], precision=hp) + params['se1_b'])
    w6 = 1.0 / (1.0 + jnp.exp(-(jnp.dot(h, params['se2_w'], precision=hp) + params['se2_b'])))
    pieces = [w6[:, i:i + 1] * feat[:, a:b] for i, (a, b) in enumerate(seg)]
    se_out = jnp.concatenate(pieces, axis=1)
    h1 = jax.nn.relu(jnp.dot(se_out, params['fc1_w'], precision=hp) + params['fc1_b'])
    h2 = jax.nn.relu(jnp.dot(h1, params['fc2_w'], precision=hp) + params['fc2_b'])
    h3 = jax.nn.relu(jnp.dot(h2, params['fc3_w'], precision=hp) + params['fc3_b'])
    logits = jnp.dot(h3, params['fc4_w'], precision=hp) + params['fc4_b']
    return jax.nn.softmax(logits, axis=1)


def init_params(key, vocab, input_dim=INPUT_DIM, output_dim=OUTPUT_DIM):
    ks = jax.random.split(key, 10)

    def linear(k, fan_in, fan_out):
        kw, kb = jax.random.split(k)
        bound = 1.0 / np.sqrt(fan_in)
        w = jax.random.uniform(kw, (fan_in, fan_out), jnp.float32, -bound, bound)
        b = jax.random.uniform(kb, (1, fan_out), jnp.float32, -bound, bound)
        return w, b

    p = {}
    p['embed'] = jax.random.normal(ks[0], (vocab, EMBED_DIM), jnp.float32)
    p['wq'], p['bq'] = linear(ks[1], input_dim, input_dim)
    p['wk'], p['bk'] = linear(ks[2], input_dim, input_dim)
    p['wv'], p['bv'] = linear(ks[3], input_dim, input_dim)
    p['se1_w'], p['se1_b'] = linear(ks[4], 6, 2)
    p['se2_w'], p['se2_b'] = linear(ks[5], 2, 6)
    p['fc1_w'], p['fc1_b'] = linear(ks[6], 2 * input_dim, input_dim)
    p['fc2_w'], p['fc2_b'] = linear(ks[7], input_dim, input_dim // 2)
    p['fc3_w'], p['fc3_b'] = linear(ks[8], input_dim // 2, input_dim // 4)
    p['fc4_w'], p['fc4_b'] = linear(ks[9], input_dim // 4, output_dim)
    return p


if __name__ == "__main__":
    key = jax.random.PRNGKey(0)
    kp, kx, kid = jax.random.split(key, 3)

    B, S = 2, 8
    vocab = 1000   # synthetic small vocab (real model uses 1410675; lookup is plain-JAX glue)
    params = init_params(kp, vocab)

    ids = jax.random.randint(kid, (B, S, 1), 0, vocab).astype(jnp.float32)
    feats = jax.random.normal(kx, (B, S, RAW_FEATS - 1), jnp.float32)
    x_raw = jnp.concatenate([ids, feats], axis=2)                     # (B, S, 28)

    mask_np = np.zeros((B, S), np.float32)
    mask_np[0, :5] = 1.0   # seq_len = 5
    mask_np[1, :8] = 1.0   # seq_len = 8
    mask = jnp.asarray(mask_np)

    out = jax.block_until_ready(model_forward(params, x_raw, mask))
    ref = reference_forward(params, x_raw, mask)

    assert out.shape == (B, OUTPUT_DIM)
    np.testing.assert_allclose(np.asarray(out), np.asarray(ref), atol=2e-3, rtol=2e-2)
    np.testing.assert_allclose(np.asarray(out).sum(axis=1), np.ones(B), atol=1e-5)
    print("KERNEL_OK")
</pallas_src>

<mosaic_0001>
module attributes {stable_mosaic.version = 11 : i64} {
  func.func @_model_kernel(%arg0: i32, %arg1: memref<8x8x20xf32, #tpu.memory_space<vmem>>, %arg2: memref<8x8x27xf32, #tpu.memory_space<vmem>>, %arg3: memref<8x1xi32, #tpu.memory_space<vmem>>, %arg4: memref<20x384xf32, #tpu.memory_space<vmem>>, %arg5: memref<27x384xf32, #tpu.memory_space<vmem>>, %arg6: memref<1x384xf32, #tpu.memory_space<vmem>>, %arg7: memref<128x2xf32, #tpu.memory_space<vmem>>, %arg8: memref<20x2xf32, #tpu.memory_space<vmem>>, %arg9: memref<27x2xf32, #tpu.memory_space<vmem>>, %arg10: memref<1x2xf32, #tpu.memory_space<vmem>>, %arg11: memref<2x6xf32, #tpu.memory_space<vmem>>, %arg12: memref<1x6xf32, #tpu.memory_space<vmem>>, %arg13: memref<3x128xf32, #tpu.memory_space<vmem>>, %arg14: memref<2x27xf32, #tpu.memory_space<vmem>>, %arg15: memref<128x47xf32, #tpu.memory_space<vmem>>, %arg16: memref<20x47xf32, #tpu.memory_space<vmem>>, %arg17: memref<27x47xf32, #tpu.memory_space<vmem>>, %arg18: memref<1x47xf32, #tpu.memory_space<vmem>>, %arg19: memref<47x23xf32, #tpu.memory_space<vmem>>, %arg20: memref<1x23xf32, #tpu.memory_space<vmem>>, %arg21: memref<23x11xf32, #tpu.memory_space<vmem>>, %arg22: memref<1x11xf32, #tpu.memory_space<vmem>>, %arg23: memref<11x2xf32, #tpu.memory_space<vmem>>, %arg24: memref<1x2xf32, #tpu.memory_space<vmem>>, %arg25: memref<8x2xf32, #tpu.memory_space<vmem>>) attributes {dimension_semantics = [#tpu.dimension_semantics<parallel>], iteration_bounds = array<i64: 1>, scalar_prefetch = 0 : i64, scratch_operands = 0 : i64, tpu.core_type = #tpu.core_type<tc>, window_params = [{transform_indices = @transform_0, window_bounds = array<i64: 8, 8, 20>}, {transform_indices = @transform_1, window_bounds = array<i64: 8, 8, 27>}, {transform_indices = @transform_2, window_bounds = array<i64: 8, 1>}, {pipeline_mode = #tpu.pipeline_mode<synchronous>, transform_indices = @transform_3, window_bounds = array<i64: 20, 384>}, {pipeline_mode = #tpu.pipeline_mode<synchronous>, transform_indices = @transform_4, window_bounds = array<i64: 27, 384>}, {pipeline_mode = #tpu.pipeline_mode<synchronous>, transform_indices = @transform_5, window_bounds = array<i64: 1, 384>}, {pipeline_mode = #tpu.pipeline_mode<synchronous>, transform_indices = @transform_6, window_bounds = array<i64: 128, 2>}, {pipeline_mode = #tpu.pipeline_mode<synchronous>, transform_indices = @transform_7, window_bounds = array<i64: 20, 2>}, {pipeline_mode = #tpu.pipeline_mode<synchronous>, transform_indices = @transform_8, window_bounds = array<i64: 27, 2>}, {pipeline_mode = #tpu.pipeline_mode<synchronous>, transform_indices = @transform_9, window_bounds = array<i64: 1, 2>}, {pipeline_mode = #tpu.pipeline_mode<synchronous>, transform_indices = @transform_10, window_bounds = array<i64: 2, 6>}, {pipeline_mode = #tpu.pipeline_mode<synchronous>, transform_indices = @transform_11, window_bounds = array<i64: 1, 6>}, {pipeline_mode = #tpu.pipeline_mode<synchronous>, transform_indices = @transform_12, window_bounds = array<i64: 3, 128>}, {pipeline_mode = #tpu.pipeline_mode<synchronous>, transform_indices = @transform_13, window_bounds = array<i64: 2, 27>}, {pipeline_mode = #tpu.pipeline_mode<synchronous>, transform_indices = @transform_14, window_bounds = array<i64: 128, 47>}, {pipeline_mode = #tpu.pipeline_mode<synchronous>, transform_indices = @transform_15, window_bounds = array<i64: 20, 47>}, {pipeline_mode = #tpu.pipeline_mode<synchronous>, transform_indices = @transform_16, window_bounds = array<i64: 27, 47>}, {pipeline_mode = #tpu.pipeline_mode<synchronous>, transform_indices = @transform_17, window_bounds = array<i64: 1, 47>}, {pipeline_mode = #tpu.pipeline_mode<synchronous>, transform_indices = @transform_18, window_bounds = array<i64: 47, 23>}, {pipeline_mode = #tpu.pipeline_mode<synchronous>, transform_indices = @transform_19, window_bounds = array<i64: 1, 23>}, {pipeline_mode = #tpu.pipeline_mode<synchronous>, transform_indices = @transform_20, window_bounds = array<i64: 23, 11>}, {pipeline_mode = #tpu.pipeline_mode<synchronous>, transform_indices = @transform_21, window_bounds = array<i64: 1, 11>}, {pipeline_mode = #tpu.pipeline_mode<synchronous>, transform_indices = @transform_22, window_bounds = array<i64: 11, 2>}, {pipeline_mode = #tpu.pipeline_mode<synchronous>, transform_indices = @transform_23, window_bounds = array<i64: 1, 2>}, {transform_indices = @transform_24, window_bounds = array<i64: 8, 2>}]} {
    %c0 = arith.constant 0 : index
    %c0_0 = arith.constant 0 : index
    %c0_1 = arith.constant 0 : index
    %0 = vector.load %arg1[%c0, %c0_0, %c0_1] : memref<8x8x20xf32, #tpu.memory_space<vmem>>, vector<8x8x20xf32>
    %c0_2 = arith.constant 0 : index
    %c0_3 = arith.constant 0 : index
    %c0_4 = arith.constant 0 : index
    %1 = vector.load %arg2[%c0_2, %c0_3, %c0_4] : memref<8x8x27xf32, #tpu.memory_space<vmem>>, vector<8x8x27xf32>
    %c0_5 = arith.constant 0 : index
    %c0_6 = arith.constant 0 : index
    %2 = vector.load %arg3[%c0_5, %c0_6] : memref<8x1xi32, #tpu.memory_space<vmem>>, vector<8x1xi32>
    %3 = tpu.iota {dimensions = array<i32: 1>} : vector<8x8xi32>
    %4 = tpu.iota {dimensions = array<i32: 1>} : vector<8x8x1xi32>
    %c1_i32 = arith.constant 1 : i32
    %5 = vector.broadcast %c1_i32 : i32 to vector<8x1xi32>
    %6 = arith.subi %2, %5 : vector<8x1xi32>
    %7 = vector.shape_cast %6 : vector<8x1xi32> to vector<8x1x1xi32>
    %8 = vector.broadcast %7 : vector<8x1x1xi32> to vector<8x8x1xi32>
    %9 = arith.cmpi eq, %4, %8 : vector<8x8x1xi32>
    %10 = arith.extui %9 : vector<8x8x1xi1> to vector<8x8x1xi32>
    %11 = arith.sitofp %10 : vector<8x8x1xi32> to vector<8x8x1xf32>
    %c1_i32_7 = arith.constant 1 : i32
    %12 = vector.broadcast %c1_i32_7 : i32 to vector<8x1xi32>
    %13 = arith.subi %2, %12 : vector<8x1xi32>
    %14 = vector.broadcast %13 : vector<8x1xi32> to vector<8x8xi32>
    %15 = arith.cmpi slt, %3, %14 : vector<8x8xi32>
    %16 = arith.extui %15 : vector<8x8xi1> to vector<8x8xi32>
    %17 = arith.sitofp %16 : vector<8x8xi32> to vector<8x8xf32>
    %18 = vector.shape_cast %0 : vector<8x8x20xf32> to vector<64x20xf32>
    %19 = vector.shape_cast %1 : vector<8x8x27xf32> to vector<64x27xf32>
    %c0_8 = arith.constant 0 : index
    %c0_9 = arith.constant 0 : index
    %20 = vector.load %arg4[%c0_8, %c0_9] : memref<20x384xf32, #tpu.memory_space<vmem>>, vector<20x384xf32>
    %cst = arith.constant dense<0.000000e+00> : vector<64x384xf32>
    %21 = tpu.matmul %18, %20, %cst {dimension_numbers = #tpu.dot_dimension_numbers<[1], [0], [0], [1], [0, 0, 1, 1], [], []>} : vector<64x20xf32>, vector<20x384xf32>, vector<64x384xf32> -> vector<64x384xf32>
    %c0_10 = arith.constant 0 : index
    %c0_11 = arith.constant 0 : index
    %22 = vector.load %arg5[%c0_10, %c0_11] : memref<27x384xf32, #tpu.memory_space<vmem>>, vector<27x384xf32>
    %cst_12 = arith.constant dense<0.000000e+00> : vector<64x384xf32>
    %23 = tpu.matmul %19, %22, %cst_12 {dimension_numbers = #tpu.dot_dimension_numbers<[1], [0], [0], [1], [0, 0, 1, 1], [], []>} : vector<64x27xf32>, vector<27x384xf32>, vector<64x384xf32> -> vector<64x384xf32>
    %24 = arith.addf %21, %23 : vector<64x384xf32>
    %c0_13 = arith.constant 0 : index
    %c0_14 = arith.constant 0 : index
    %25 = vector.load %arg6[%c0_13, %c0_14] : memref<1x384xf32, #tpu.memory_space<vmem>>, vector<1x384xf32>
    %26 = vector.broadcast %25 : vector<1x384xf32> to vector<64x384xf32>
    %27 = arith.addf %24, %26 : vector<64x384xf32>
    %28 = vector.shape_cast %27 : vector<64x384xf32> to vector<8x8x384xf32>
    %29 = vector.extract_strided_slice %28 {offsets = [0, 0, 0], sizes = [8, 8, 128], strides = [1, 1, 1]} : vector<8x8x384xf32> to vector<8x8x128xf32>
    %30 = vector.extract_strided_slice %28 {offsets = [0, 0, 128], sizes = [8, 8, 128], strides = [1, 1, 1]} : vector<8x8x384xf32> to vector<8x8x128xf32>
    %31 = vector.extract_strided_slice %28 {offsets = [0, 0, 256], sizes = [8, 8, 128], strides = [1, 1, 1]} : vector<8x8x384xf32> to vector<8x8x128xf32>
    %32 = vector.broadcast %11 : vector<8x8x1xf32> to vector<8x8x128xf32>
    %33 = arith.mulf %32, %29 : vector<8x8x128xf32>
    %cst_15 = arith.constant dense<0.000000e+00> : vector<8x128xf32>
    %34 = vector.multi_reduction <add>, %33, %cst_15 [1] : vector<8x8x128xf32> to vector<8x128xf32>
    %35 = vector.shape_cast %34 : vector<8x128xf32> to vector<8x1x128xf32>
    %36 = vector.broadcast %35 : vector<8x1x128xf32> to vector<8x8x128xf32>
    %37 = arith.mulf %36, %30 : vector<8x8x128xf32>
    %cst_16 = arith.constant dense<0.000000e+00> : vector<8x8xf32>
    %38 = vector.multi_reduction <add>, %37, %cst_16 [2] : vector<8x8x128xf32> to vector<8x8xf32>
    %cst_17 = arith.constant -1.000000e+30 : f32
    %39 = vector.broadcast %cst_17 : f32 to vector<8x8xf32>
    %40 = arith.select %15, %38, %39 : vector<8x8xi1>, vector<8x8xf32>
    %cst_18 = arith.constant dense<0xFF800000> : vector<8xf32>
    %41 = vector.multi_reduction <maximumf>, %40, %cst_18 [1] : vector<8x8xf32> to vector<8xf32>
    %42 = vector.shape_cast %41 : vector<8xf32> to vector<8x1xf32>
    %43 = vector.broadcast %42 : vector<8x1xf32> to vector<8x8xf32>
    %44 = arith.subf %40, %43 : vector<8x8xf32>
    %45 = math.exp %44 : vector<8x8xf32>
    %46 = arith.mulf %45, %17 : vector<8x8xf32>
    %cst_19 = arith.constant dense<0.000000e+00> : vector<8xf32>
    %47 = vector.multi_reduction <add>, %46, %cst_19 [1] : vector<8x8xf32> to vector<8xf32>
    %48 = vector.shape_cast %47 : vector<8xf32> to vector<8x1xf32>
    %cst_20 = arith.constant 1.000000e-30 : f32
    %49 = vector.broadcast %cst_20 : f32 to vector<8x1xf32>
    %50 = arith.maximumf %48, %49 : vector<8x1xf32>
    %51 = tpu.reciprocal %50 {approx = true} : vector<8x1xf32> -> vector<8x1xf32>
    %52 = vector.broadcast %51 : vector<8x1xf32> to vector<8x8xf32>
    %53 = arith.mulf %46, %52 : vector<8x8xf32>
    %54 = vector.shape_cast %53 : vector<8x8xf32> to vector<8x8x1xf32>
    %55 = vector.broadcast %54 : vector<8x8x1xf32> to vector<8x8x128xf32>
    %56 = arith.mulf %55, %31 : vector<8x8x128xf32>
    %cst_21 = arith.constant dense<0.000000e+00> : vector<8x128xf32>
    %57 = vector.multi_reduction <add>, %56, %cst_21 [1] : vector<8x8x128xf32> to vector<8x128xf32>
    %58 = math.tanh %57 : vector<8x128xf32>
    %59 = vector.extract_strided_slice %0 {offsets = [0, 7, 0], sizes = [8, 1, 20], strides = [1, 1, 1]} : vector<8x8x20xf32> to vector<8x1x20xf32>
    %60 = vector.shape_cast %59 : vector<8x1x20xf32> to vector<8x20xf32>
    %61 = vector.extract_strided_slice %1 {offsets = [0, 7, 0], sizes = [8, 1, 27], strides = [1, 1, 1]} : vector<8x8x27xf32> to vector<8x1x27xf32>
    %62 = vector.shape_cast %61 : vector<8x1x27xf32> to vector<8x27xf32>
    %c0_22 = arith.constant 0 : index
    %c0_23 = arith.constant 0 : index
    %63 = vector.load %arg7[%c0_22, %c0_23] : memref<128x2xf32, #tpu.memory_space<vmem>>, vector<128x2xf32>
    %cst_24 = arith.constant dense<0.000000e+00> : vector<8x2xf32>
    %64 = tpu.matmul %58, %63, %cst_24 {dimension_numbers = #tpu.dot_dimension_numbers<[1], [0], [0], [1], [0, 0, 1, 1], [], []>} : vector<8x128xf32>, vector<128x2xf32>, vector<8x2xf32> -> vector<8x2xf32>
    %c0_25 = arith.constant 0 : index
    %c0_26 = arith.constant 0 : index
    %65 = vector.load %arg8[%c0_25, %c0_26] : memref<20x2xf32, #tpu.memory_space<vmem>>, vector<20x2xf32>
    %cst_27 = arith.constant dense<0.000000e+00> : vector<8x2xf32>
    %66 = tpu.matmul %60, %65, %cst_27 {dimension_numbers = #tpu.dot_dimension_numbers<[1], [0], [0], [1], [0, 0, 1, 1], [], []>} : vector<8x20xf32>, vector<20x2xf32>, vector<8x2xf32> -> vector<8x2xf32>
    %67 = arith.addf %64, %66 : vector<8x2xf32>
    %c0_28 = arith.constant 0 : index
    %c0_29 = arith.constant 0 : index
    %68 = vector.load %arg9[%c0_28, %c0_29] : memref<27x2xf32, #tpu.memory_space<vmem>>, vector<27x2xf32>
    %cst_30 = arith.constant dense<0.000000e+00> : vector<8x2xf32>
    %69 = tpu.matmul %62, %68, %cst_30 {dimension_numbers = #tpu.dot_dimension_numbers<[1], [0], [0], [1], [0, 0, 1, 1], [], []>} : vector<8x27xf32>, vector<27x2xf32>, vector<8x2xf32> -> vector<8x2xf32>
    %70 = arith.addf %67, %69 : vector<8x2xf32>
    %c0_31 = arith.constant 0 : index
    %c0_32 = arith.constant 0 : index
    %71 = vector.load %arg10[%c0_31, %c0_32] : memref<1x2xf32, #tpu.memory_space<vmem>>, vector<1x2xf32>
    %72 = vector.broadcast %71 : vector<1x2xf32> to vector<8x2xf32>
    %73 = arith.addf %70, %72 : vector<8x2xf32>
    %cst_33 = arith.constant 0.000000e+00 : f32
    %74 = vector.broadcast %cst_33 : f32 to vector<8x2xf32>
    %75 = arith.maximumf %73, %74 : vector<8x2xf32>
    %c0_34 = arith.constant 0 : index
    %c0_35 = arith.constant 0 : index
    %76 = vector.load %arg11[%c0_34, %c0_35] : memref<2x6xf32, #tpu.memory_space<vmem>>, vector<2x6xf32>
    %cst_36 = arith.constant dense<0.000000e+00> : vector<8x6xf32>
    %77 = tpu.matmul %75, %76, %cst_36 {dimension_numbers = #tpu.dot_dimension_numbers<[1], [0], [0], [1], [0, 0, 1, 1], [], []>} : vector<8x2xf32>, vector<2x6xf32>, vector<8x6xf32> -> vector<8x6xf32>
    %c0_37 = arith.constant 0 : index
    %c0_38 = arith.constant 0 : index
    %78 = vector.load %arg12[%c0_37, %c0_38] : memref<1x6xf32, #tpu.memory_space<vmem>>, vector<1x6xf32>
    %79 = vector.broadcast %78 : vector<1x6xf32> to vector<8x6xf32>
    %80 = arith.addf %77, %79 : vector<8x6xf32>
    %cst_39 = arith.constant 0.000000e+00 : f32
    %81 = vector.broadcast %cst_39 : f32 to vector<8x6xf32>
    %82 = arith.subf %81, %80 : vector<8x6xf32>
    %83 = math.exp %82 : vector<8x6xf32>
    %cst_40 = arith.constant 1.000000e+00 : f32
    %84 = vector.broadcast %cst_40 : f32 to vector<8x6xf32>
    %85 = arith.addf %84, %83 : vector<8x6xf32>
    %cst_41 = arith.constant 1.000000e+00 : f32
    %86 = vector.broadcast %cst_41 : f32 to vector<8x6xf32>
    %87 = arith.divf %86, %85 : vector<8x6xf32>
    %88 = vector.extract_strided_slice %87 {offsets = [0, 0], sizes = [8, 3], strides = [1, 1]} : vector<8x6xf32> to vector<8x3xf32>
    %c0_42 = arith.constant 0 : index
    %c0_43 = arith.constant 0 : index
    %89 = vector.load %arg13[%c0_42, %c0_43] : memref<3x128xf32, #tpu.memory_space<vmem>>, vector<3x128xf32>
    %cst_44 = arith.constant dense<0.000000e+00> : vector<8x128xf32>
    %90 = tpu.matmul %88, %89, %cst_44 {dimension_numbers = #tpu.dot_dimension_numbers<[1], [0], [0], [1], [0, 0, 1, 1], [], []>} : vector<8x3xf32>, vector<3x128xf32>, vector<8x128xf32> -> vector<8x128xf32>
    %91 = arith.mulf %58, %90 : vector<8x128xf32>
    %92 = vector.extract_strided_slice %87 {offsets = [0, 3], sizes = [8, 1], strides = [1, 1]} : vector<8x6xf32> to vector<8x1xf32>
    %93 = vector.broadcast %92 : vector<8x1xf32> to vector<8x20xf32>
    %94 = arith.mulf %60, %93 : vector<8x20xf32>
    %95 = vector.extract_strided_slice %87 {offsets = [0, 4], sizes = [8, 2], strides = [1, 1]} : vector<8x6xf32> to vector<8x2xf32>
    %c0_45 = arith.constant 0 : index
    %c0_46 = arith.constant 0 : index
    %96 = vector.load %arg14[%c0_45, %c0_46] : memref<2x27xf32, #tpu.memory_space<vmem>>, vector<2x27xf32>
    %cst_47 = arith.constant dense<0.000000e+00> : vector<8x27xf32>
    %97 = tpu.matmul %95, %96, %cst_47 {dimension_numbers = #tpu.dot_dimension_numbers<[1], [0], [0], [1], [0, 0, 1, 1], [], []>} : vector<8x2xf32>, vector<2x27xf32>, vector<8x27xf32> -> vector<8x27xf32>
    %98 = arith.mulf %62, %97 : vector<8x27xf32>
    %c0_48 = arith.constant 0 : index
    %c0_49 = arith.constant 0 : index
    %99 = vector.load %arg15[%c0_48, %c0_49] : memref<128x47xf32, #tpu.memory_space<vmem>>, vector<128x47xf32>
    %cst_50 = arith.constant dense<0.000000e+00> : vector<8x47xf32>
    %100 = tpu.matmul %91, %99, %cst_50 {dimension_numbers = #tpu.dot_dimension_numbers<[1], [0], [0], [1], [0, 0, 1, 1], [], []>} : vector<8x128xf32>, vector<128x47xf32>, vector<8x47xf32> -> vector<8x47xf32>
    %c0_51 = arith.constant 0 : index
    %c0_52 = arith.constant 0 : index
    %101 = vector.load %arg16[%c0_51, %c0_52] : memref<20x47xf32, #tpu.memory_space<vmem>>, vector<20x47xf32>
    %cst_53 = arith.constant dense<0.000000e+00> : vector<8x47xf32>
    %102 = tpu.matmul %94, %101, %cst_53 {dimension_numbers = #tpu.dot_dimension_numbers<[1], [0], [0], [1], [0, 0, 1, 1], [], []>} : vector<8x20xf32>, vector<20x47xf32>, vector<8x47xf32> -> vector<8x47xf32>
    %103 = arith.addf %100, %102 : vector<8x47xf32>
    %c0_54 = arith.constant 0 : index
    %c0_55 = arith.constant 0 : index
    %104 = vector.load %arg17[%c0_54, %c0_55] : memref<27x47xf32, #tpu.memory_space<vmem>>, vector<27x47xf32>
    %cst_56 = arith.constant dense<0.000000e+00> : vector<8x47xf32>
    %105 = tpu.matmul %98, %104, %cst_56 {dimension_numbers = #tpu.dot_dimension_numbers<[1], [0], [0], [1], [0, 0, 1, 1], [], []>} : vector<8x27xf32>, vector<27x47xf32>, vector<8x47xf32> -> vector<8x47xf32>
    %106 = arith.addf %103, %105 : vector<8x47xf32>
    %c0_57 = arith.constant 0 : index
    %c0_58 = arith.constant 0 : index
    %107 = vector.load %arg18[%c0_57, %c0_58] : memref<1x47xf32, #tpu.memory_space<vmem>>, vector<1x47xf32>
    %108 = vector.broadcast %107 : vector<1x47xf32> to vector<8x47xf32>
    %109 = arith.addf %106, %108 : vector<8x47xf32>
    %cst_59 = arith.constant 0.000000e+00 : f32
    %110 = vector.broadcast %cst_59 : f32 to vector<8x47xf32>
    %111 = arith.maximumf %109, %110 : vector<8x47xf32>
    %c0_60 = arith.constant 0 : index
    %c0_61 = arith.constant 0 : index
    %112 = vector.load %arg19[%c0_60, %c0_61] : memref<47x23xf32, #tpu.memory_space<vmem>>, vector<47x23xf32>
    %cst_62 = arith.constant dense<0.000000e+00> : vector<8x23xf32>
    %113 = tpu.matmul %111, %112, %cst_62 {dimension_numbers = #tpu.dot_dimension_numbers<[1], [0], [0], [1], [0, 0, 1, 1], [], []>} : vector<8x47xf32>, vector<47x23xf32>, vector<8x23xf32> -> vector<8x23xf32>
    %c0_63 = arith.constant 0 : index
    %c0_64 = arith.constant 0 : index
    %114 = vector.load %arg20[%c0_63, %c0_64] : memref<1x23xf32, #tpu.memory_space<vmem>>, vector<1x23xf32>
    %115 = vector.broadcast %114 : vector<1x23xf32> to vector<8x23xf32>
    %116 = arith.addf %113, %115 : vector<8x23xf32>
    %cst_65 = arith.constant 0.000000e+00 : f32
    %117 = vector.broadcast %cst_65 : f32 to vector<8x23xf32>
    %118 = arith.maximumf %116, %117 : vector<8x23xf32>
    %c0_66 = arith.constant 0 : index
    %c0_67 = arith.constant 0 : index
    %119 = vector.load %arg21[%c0_66, %c0_67] : memref<23x11xf32, #tpu.memory_space<vmem>>, vector<23x11xf32>
    %cst_68 = arith.constant dense<0.000000e+00> : vector<8x11xf32>
    %120 = tpu.matmul %118, %119, %cst_68 {dimension_numbers = #tpu.dot_dimension_numbers<[1], [0], [0], [1], [0, 0, 1, 1], [], []>} : vector<8x23xf32>, vector<23x11xf32>, vector<8x11xf32> -> vector<8x11xf32>
    %c0_69 = arith.constant 0 : index
    %c0_70 = arith.constant 0 : index
    %121 = vector.load %arg22[%c0_69, %c0_70] : memref<1x11xf32, #tpu.memory_space<vmem>>, vector<1x11xf32>
    %122 = vector.broadcast %121 : vector<1x11xf32> to vector<8x11xf32>
    %123 = arith.addf %120, %122 : vector<8x11xf32>
    %cst_71 = arith.constant 0.000000e+00 : f32
    %124 = vector.broadcast %cst_71 : f32 to vector<8x11xf32>
    %125 = arith.maximumf %123, %124 : vector<8x11xf32>
    %c0_72 = arith.constant 0 : index
    %c0_73 = arith.constant 0 : index
    %126 = vector.load %arg23[%c0_72, %c0_73] : memref<11x2xf32, #tpu.memory_space<vmem>>, vector<11x2xf32>
    %cst_74 = arith.constant dense<0.000000e+00> : vector<8x2xf32>
    %127 = tpu.matmul %125, %126, %cst_74 {dimension_numbers = #tpu.dot_dimension_numbers<[1], [0], [0], [1], [0, 0, 1, 1], [], []>} : vector<8x11xf32>, vector<11x2xf32>, vector<8x2xf32> -> vector<8x2xf32>
    %c0_75 = arith.constant 0 : index
    %c0_76 = arith.constant 0 : index
    %128 = vector.load %arg24[%c0_75, %c0_76] : memref<1x2xf32, #tpu.memory_space<vmem>>, vector<1x2xf32>
    %129 = vector.broadcast %128 : vector<1x2xf32> to vector<8x2xf32>
    %130 = arith.addf %127, %129 : vector<8x2xf32>
    %cst_77 = arith.constant 0.000000e+00 : f32
    %131 = vector.broadcast %cst_77 : f32 to vector<8x2xf32>
    %132 = arith.subf %131, %130 : vector<8x2xf32>
    %133 = math.exp %132 : vector<8x2xf32>
    %cst_78 = arith.constant 1.000000e+00 : f32
    %134 = vector.broadcast %cst_78 : f32 to vector<8x2xf32>
    %135 = arith.addf %134, %133 : vector<8x2xf32>
    %cst_79 = arith.constant 1.000000e+00 : f32
    %136 = vector.broadcast %cst_79 : f32 to vector<8x2xf32>
    %137 = arith.divf %136, %135 : vector<8x2xf32>
    %c0_80 = arith.constant 0 : index
    %c0_81 = arith.constant 0 : index
    %138 = vector.load %arg25[%c0_80, %c0_81] : memref<8x2xf32, #tpu.memory_space<vmem>>, vector<8x2xf32>
    tpu.vector_store %arg25[%c0_80, %c0_81], %137 {strides = array<i32>} : memref<8x2xf32, #tpu.memory_space<vmem>>, vector<8x2xf32>,
    return
  }
  func.func @transform_0(%arg0: i32) -> (i32, i32, i32) {
    %c0_i32 = arith.constant 0 : i32
    %c0_i32_0 = arith.constant 0 : i32
    %c0_i32_1 = arith.constant 0 : i32
    return %arg0, %c0_i32, %c0_i32_0 : i32, i32, i32
  }
  func.func @transform_1(%arg0: i32) -> (i32, i32, i32) {
    %c0_i32 = arith.constant 0 : i32
    %c0_i32_0 = arith.constant 0 : i32
    %c0_i32_1 = arith.constant 0 : i32
    return %arg0, %c0_i32, %c0_i32_0 : i32, i32, i32
  }
  func.func @transform_2(%arg0: i32) -> (i32, i32) {
    %c0_i32 = arith.constant 0 : i32
    %c0_i32_0 = arith.constant 0 : i32
    return %arg0, %c0_i32 : i32, i32
  }
  func.func @transform_3(%arg0: i32) -> (i32, i32) {
    %c0_i32 = arith.constant 0 : i32
    %c0_i32_0 = arith.constant 0 : i32
    %c0_i32_1 = arith.constant 0 : i32
    return %c0_i32, %c0_i32_0 : i32, i32
  }
  func.func @transform_4(%arg0: i32) -> (i32, i32) {
    %c0_i32 = arith.constant 0 : i32
    %c0_i32_0 = arith.constant 0 : i32
    %c0_i32_1 = arith.constant 0 : i32
    return %c0_i32, %c0_i32_0 : i32, i32
  }
  func.func @transform_5(%arg0: i32) -> (i32, i32) {
    %c0_i32 = arith.constant 0 : i32
    %c0_i32_0 = arith.constant 0 : i32
    %c0_i32_1 = arith.constant 0 : i32
    return %c0_i32, %c0_i32_0 : i32, i32
  }
  func.func @transform_6(%arg0: i32) -> (i32, i32) {
    %c0_i32 = arith.constant 0 : i32
    %c0_i32_0 = arith.constant 0 : i32
    %c0_i32_1 = arith.constant 0 : i32
    return %c0_i32, %c0_i32_0 : i32, i32
  }
  func.func @transform_7(%arg0: i32) -> (i32, i32) {
    %c0_i32 = arith.constant 0 : i32
    %c0_i32_0 = arith.constant 0 : i32
    %c0_i32_1 = arith.constant 0 : i32
    return %c0_i32, %c0_i32_0 : i32, i32
  }
  func.func @transform_8(%arg0: i32) -> (i32, i32) {
    %c0_i32 = arith.constant 0 : i32
    %c0_i32_0 = arith.constant 0 : i32
    %c0_i32_1 = arith.constant 0 : i32
    return %c0_i32, %c0_i32_0 : i32, i32
  }
  func.func @transform_9(%arg0: i32) -> (i32, i32) {
    %c0_i32 = arith.constant 0 : i32
    %c0_i32_0 = arith.constant 0 : i32
    %c0_i32_1 = arith.constant 0 : i32
    return %c0_i32, %c0_i32_0 : i32, i32
  }
  func.func @transform_10(%arg0: i32) -> (i32, i32) {
    %c0_i32 = arith.constant 0 : i32
    %c0_i32_0 = arith.constant 0 : i32
    %c0_i32_1 = arith.constant 0 : i32
    return %c0_i32, %c0_i32_0 : i32, i32
  }
  func.func @transform_11(%arg0: i32) -> (i32, i32) {
    %c0_i32 = arith.constant 0 : i32
    %c0_i32_0 = arith.constant 0 : i32
    %c0_i32_1 = arith.constant 0 : i32
    return %c0_i32, %c0_i32_0 : i32, i32
  }
  func.func @transform_12(%arg0: i32) -> (i32, i32) {
    %c0_i32 = arith.constant 0 : i32
    %c0_i32_0 = arith.constant 0 : i32
    %c0_i32_1 = arith.constant 0 : i32
    return %c0_i32, %c0_i32_0 : i32, i32
  }
  func.func @transform_13(%arg0: i32) -> (i32, i32) {
    %c0_i32 = arith.constant 0 : i32
    %c0_i32_0 = arith.constant 0 : i32
    %c0_i32_1 = arith.constant 0 : i32
    return %c0_i32, %c0_i32_0 : i32, i32
  }
  func.func @transform_14(%arg0: i32) -> (i32, i32) {
    %c0_i32 = arith.constant 0 : i32
    %c0_i32_0 = arith.constant 0 : i32
    %c0_i32_1 = arith.constant 0 : i32
    return %c0_i32, %c0_i32_0 : i32, i32
  }
  func.func @transform_15(%arg0: i32) -> (i32, i32) {
    %c0_i32 = arith.constant 0 : i32
    %c0_i32_0 = arith.constant 0 : i32
    %c0_i32_1 = arith.constant 0 : i32
    return %c0_i32, %c0_i32_0 : i32, i32
  }
  func.func @transform_16(%arg0: i32) -> (i32, i32) {
    %c0_i32 = arith.constant 0 : i32
    %c0_i32_0 = arith.constant 0 : i32
    %c0_i32_1 = arith.constant 0 : i32
    return %c0_i32, %c0_i32_0 : i32, i32
  }
  func.func @transform_17(%arg0: i32) -> (i32, i32) {
    %c0_i32 = arith.constant 0 : i32
    %c0_i32_0 = arith.constant 0 : i32
    %c0_i32_1 = arith.constant 0 : i32
    return %c0_i32, %c0_i32_0 : i32, i32
  }
  func.func @transform_18(%arg0: i32) -> (i32, i32) {
    %c0_i32 = arith.constant 0 : i32
    %c0_i32_0 = arith.constant 0 : i32
    %c0_i32_1 = arith.constant 0 : i32
    return %c0_i32, %c0_i32_0 : i32, i32
  }
  func.func @transform_19(%arg0: i32) -> (i32, i32) {
    %c0_i32 = arith.constant 0 : i32
    %c0_i32_0 = arith.constant 0 : i32
    %c0_i32_1 = arith.constant 0 : i32
    return %c0_i32, %c0_i32_0 : i32, i32
  }
  func.func @transform_20(%arg0: i32) -> (i32, i32) {
    %c0_i32 = arith.constant 0 : i32
    %c0_i32_0 = arith.constant 0 : i32
    %c0_i32_1 = arith.constant 0 : i32
    return %c0_i32, %c0_i32_0 : i32, i32
  }
  func.func @transform_21(%arg0: i32) -> (i32, i32) {
    %c0_i32 = arith.constant 0 : i32
    %c0_i32_0 = arith.constant 0 : i32
    %c0_i32_1 = arith.constant 0 : i32
    return %c0_i32, %c0_i32_0 : i32, i32
  }
  func.func @transform_22(%arg0: i32) -> (i32, i32) {
    %c0_i32 = arith.constant 0 : i32
    %c0_i32_0 = arith.constant 0 : i32
    %c0_i32_1 = arith.constant 0 : i32
    return %c0_i32, %c0_i32_0 : i32, i32
  }
  func.func @transform_23(%arg0: i32) -> (i32, i32) {
    %c0_i32 = arith.constant 0 : i32
    %c0_i32_0 = arith.constant 0 : i32
    %c0_i32_1 = arith.constant 0 : i32
    return %c0_i32, %c0_i32_0 : i32, i32
  }
  func.func @transform_24(%arg0: i32) -> (i32, i32) {
    %c0_i32 = arith.constant 0 : i32
    %c0_i32_0 = arith.constant 0 : i32
    return %arg0, %c0_i32 : i32, i32
  }
}

</mosaic_0001>

<bundles_post_ra>
// kernel: tpu_custom_call.1
= control target key start
LH: loop header
LB: loop body
LE: loop exit
PB: predicated region body
PF: predicated region fallthrough
CT: control target
= control target key end

     0   :  { %s4791_s0 = inlined_call_operand.hbm [shape: f32[8,8,20], index: 0, kind: input, shape index: {}]   ;;  %s4792_s1 = inlined_call_operand.hbm [shape: f32[8,8,27], index: 1, kind: input, shape index: {}]   ;;  %s4793_s2 = inlined_call_operand.hbm [shape: s32[8,1], index: 2, kind: input, shape index: {}]   ;;  %s4794_s3 = inlined_call_operand.hbm [shape: f32[20,384], index: 3, kind: input, shape index: {}]   ;;  %s4795_s4 = inlined_call_operand.hbm [shape: f32[27,384], index: 4, kind: input, shape index: {}]   ;;  %s4796_s5 = inlined_call_operand.hbm [shape: f32[1,384], index: 5, kind: input, shape index: {}]   ;;  %s4797_s6 = inlined_call_operand.hbm [shape: f32[128,2], index: 6, kind: input, shape index: {}]   ;;  %s4798_s7 = inlined_call_operand.hbm [shape: f32[20,2], index: 7, kind: input, shape index: {}]   ;;  %s4799_s8 = inlined_call_operand.hbm [shape: f32[27,2], index: 8, kind: input, shape index: {}]   ;;  %s4800_s9 = inlined_call_operand.hbm [shape: f32[1,2], index: 9, kind: input, shape index: {}]   ;;  %s4801_s10 = inlined_call_operand.hbm [shape: f32[2,6], index: 10, kind: input, shape index: {}]   ;;  %s4802_s11 = inlined_call_operand.hbm [shape: f32[1,6], index: 11, kind: input, shape index: {}]   ;;  %s4803_s12 = inlined_call_operand.hbm [shape: f32[3,128], index: 12, kind: input, shape index: {}]   ;;  %s4804_s13 = inlined_call_operand.hbm [shape: f32[2,27], index: 13, kind: input, shape index: {}]   ;;  %s4805_s14 = inlined_call_operand.hbm [shape: f32[128,47], index: 14, kind: input, shape index: {}]   ;;  %s4806_s15 = inlined_call_operand.hbm [shape: f32[20,47], index: 15, kind: input, shape index: {}]   ;;  %s4807_s16 = inlined_call_operand.hbm [shape: f32[27,47], index: 16, kind: input, shape index: {}]   ;;  %s4808_s17 = inlined_call_operand.hbm [shape: f32[1,47], index: 17, kind: input, shape index: {}]   ;;  %s4809_s18 = inlined_call_operand.hbm [shape: f32[47,23], index: 18, kind: input, shape index: {}]   ;;  %s4810_s19 = inlined_call_operand.hbm [shape: f32[1,23], index: 19, kind: input, shape index: {}]   ;;  %s4811_s20 = inlined_call_operand.hbm [shape: f32[23,11], index: 20, kind: input, shape index: {}]   ;;  %s4812_s21 = inlined_call_operand.hbm [shape: f32[1,11], index: 21, kind: input, shape index: {}]   ;;  %s4813_s22 = inlined_call_operand.hbm [shape: f32[11,2], index: 22, kind: input, shape index: {}]   ;;  %s4814_s23 = inlined_call_operand.hbm [shape: f32[1,2], index: 23, kind: input, shape index: {}]   ;;  %s4815_s24 = inlined_call_operand.hbm [shape: f32[8,2], index: 24, kind: output, shape index: {}]  }
   0x1   :  { %4834 = sst [smem:[#allocation55_spill]] %s4791_s0 }
   0x2   :  { %4835 = sst [smem:[#allocation56_spill]] %s4792_s1 }
   0x3   :  { %4836 = sst [smem:[#allocation57_spill]] %s4793_s2 }
   0x4   :  { %4837 = sst [smem:[#allocation58_spill]] %s4794_s3 }
   0x5   :  { %4838 = sst [smem:[#allocation59_spill]] %s4795_s4 }
   0x6   :  { %4839 = sst [smem:[#allocation60_spill]] %s4796_s5 }
   0x7   :  { %4840 = sst [smem:[#allocation61_spill]] %s4797_s6 }
   0x8   :  { %4841 = sst [smem:[#allocation62_spill]] %s4798_s7 }
   0x9   :  { %4842 = sst [smem:[#allocation63_spill]] %s4799_s8 }
   0xa   :  { %4843 = sst [smem:[#allocation64_spill]] %s4813_s22 }
   0xb   :  { %4844 = sst [smem:[#allocation65_spill]] %s4814_s23 }
   0xc   :  { %4845 = sst [smem:[#allocation66_spill]] %s4815_s24 }
   0xd   :  { %29 = vsyncpa [#allocation3], 0 }
   0xe   :  { %30 = vsyncpa [#allocation6], 0 }
   0xf   :  { %31 = vsyncpa [#allocation9], 0 }
  0x10   :  { %32 = vsyncpa [#allocation12], 0 }
  0x11   :  { %33 = vsyncpa [#allocation15], 0 }
  0x12   :  { %34 = vsyncpa [#allocation18], 0 }
  0x13   :  { %35 = vsyncpa [#allocation21], 0 }
  0x14   :  { %36 = vsyncpa [#allocation24], 0 }
  0x15   :  { %37 = vsyncpa [#allocation27], 0 }
  0x16   :  { %38 = vsyncpa [#allocation30], 0 }
  0x17   :  { %39 = vsyncpa [#allocation33], 0 }
  0x18   :  { %40 = vsyncpa [#allocation36], 0 }
  0x19   :  { %41 = vsyncpa [#allocation39], 0 }
  0x1a   :  { %42 = vsyncpa [#allocation4], 0  ;;  %s3808_s5 = smov [#allocation5]   ;;  %s3809_s27 = smov [#allocation8]  }
  0x1b   :  { %s60_s26 = sshll.u32 %s3808_s5, 4  ;;  %s82_s28 = sshll.u32 %s3809_s27, 4  ;;  %s61_s26 = int_to_ptr.vmem [resolvable:$true] %s60_s26  ;;  %s3970_s28 = int_to_ptr.vmem [resolvable:$true] %s82_s28 }
  0x1c   :  { %s4846_s29 = sld [smem:[#allocation56_spill]] }
  0x22   :  { %s3230_s0 = scalar_lea.hbm %s4846_s29, 1024 }
  0x23   :  { %p3231_p0 = scmp.ne.s32.totalorder %s4846_s29, %s3230_s0  ;;  %p3234_p1 = scmp.lt.u32.totalorder %s3230_s0, %s4846_s29 }
  0x25   :  { %p3236_p2 = pnand %p3234_p1, %p3231_p0 }
  0x27   :  { %3239 = shalt.err (!%p3236_p2)
}
  0x28   :  { %s3240_s8 = scalar_lea.vmem %s61_s26, 1024  ;;  %p3245_p4 = scmp.lt.s32.totalorder %s61_s26, %s61_s26 }
  0x29   :  { %p3241_p3 = scmp.ne.s32.totalorder %s61_s26, %s3240_s8  ;;  %p3246_p5 = scmp.lt.s32.totalorder %s3240_s8, %s3240_s8 }
  0x2b   :  { %p3247_p6 = por %p3246_p5, %p3245_p4 }
  0x2d   :  { %p3248_p7 = pnand %p3247_p6, %p3241_p3 }
  0x2f   :  { %3251 = shalt.err (!%p3248_p7)
}
  0x30   :  { %s4826_s4 = smov 128   ;;  %s4828_s1 = smov 8  }
  0x31   :  { %66 = dma.hbm_to_vmem [thread:$0]  %s4846_s29, 1024, %s61_s26, [#allocation6], %s4826_s4, %s4826_s4, %s4828_s1  }
  0x32   :  { %s4847_s0 = sld [smem:[#allocation58_spill]] }
  0x38   :  { %s3252_s7 = scalar_lea.hbm %s4847_s0, 1152 }
  0x39   :  { %p3253_p8 = scmp.ne.s32.totalorder %s4847_s0, %s3252_s7  ;;  %p3256_p9 = scmp.lt.u32.totalorder %s3252_s7, %s4847_s0 }
  0x3b   :  { %p3258_p10 = pnand %p3256_p9, %p3253_p8 }
  0x3d   :  { %3261 = shalt.err (!%p3258_p10)
}
  0x3e   :  { %s3262_s24 = scalar_lea.vmem %s3970_s28, 1152  ;;  %p3267_p12 = scmp.lt.s32.totalorder %s3970_s28, %s3970_s28 }
  0x3f   :  { %p3263_p11 = scmp.ne.s32.totalorder %s3970_s28, %s3262_s24  ;;  %p3268_p13 = scmp.lt.s32.totalorder %s3262_s24, %s3262_s24 }
  0x41   :  { %p3269_p0 = por %p3268_p13, %p3267_p12 }
  0x43   :  { %p3270_p1 = pnand %p3269_p0, %p3263_p11 }
  0x45   :  { %3273 = shalt.err (!%p3270_p1)
}
  0x46   :  { %s4832_s26 = smov 384   ;;  %s3813_s29 = smov 24  }
  0x47   :  { %88 = dma.hbm_to_vmem [thread:$0]  %s4847_s0, 1152, %s3970_s28, [#allocation9], %s4832_s26, %s4832_s26, %s3813_s29  }
  0x48   :  { %s3814_s6 = smov [#allocation11]   ;;  %s3815_s7 = smov [#allocation14]  }
  0x49   :  { %s107_s2 = sshll.u32 %s3814_s6, 4  ;;  %s128_s30 = sshll.u32 %s3815_s7, 4  ;;  %s108_s2 = int_to_ptr.vmem [resolvable:$true] %s107_s2  ;;  %s4007_s30 = int_to_ptr.vmem [resolvable:$true] %s128_s30 }
  0x4a   :  { %s4848_s25 = sld [smem:[#allocation60_spill]] }
  0x50   :  { %s3274_s8 = scalar_lea.hbm %s4848_s25, 48 }
  0x51   :  { %p3275_p2 = scmp.ne.s32.totalorder %s4848_s25, %s3274_s8  ;;  %p3278_p3 = scmp.lt.u32.totalorder %s3274_s8, %s4848_s25 }
  0x53   :  { %p3280_p4 = pnand %p3278_p3, %p3275_p2 }
  0x55   :  { %3283 = shalt.err (!%p3280_p4)
}
  0x56   :  { %s3284_s28 = scalar_lea.vmem %s108_s2, 48  ;;  %s3288_s0 = scalar_lea.vmem %s108_s2, 64 }
  0x57   :  { %p3285_p5 = scmp.ne.s32.totalorder %s108_s2, %s3284_s28  ;;  %p3289_p6 = scmp.lt.s32.totalorder %s108_s2, %s108_s2 }
  0x58   :  { %p3290_p7 = scmp.lt.s32.totalorder %s3288_s0, %s3284_s28 }
  0x5a   :  { %p3291_p8 = por %p3290_p7, %p3289_p6 }
  0x5c   :  { %p3292_p9 = pnand %p3291_p8, %p3285_p5 }
  0x5e   :  { %3295 = shalt.err (!%p3292_p9)
}
  0x5f   :  { %110 = dma.hbm_to_vmem [thread:$0]  %s4848_s25, 48, %s108_s2, [#allocation12]  }
  0x60   :  { %s4849_s6 = sld [smem:[#allocation62_spill]] }
  0x66   :  { %s3296_s7 = scalar_lea.hbm %s4849_s6, 384 }
  0x67   :  { %p3297_p10 = scmp.ne.s32.totalorder %s4849_s6, %s3296_s7  ;;  %p3300_p11 = scmp.lt.u32.totalorder %s3296_s7, %s4849_s6 }
  0x69   :  { %p3302_p12 = pnand %p3300_p11, %p3297_p10 }
  0x6b   :  { %3305 = shalt.err (!%p3302_p12)
}
  0x6c   :  { %s3306_s8 = scalar_lea.vmem %s4007_s30, 384  ;;  %p3311_p0 = scmp.lt.s32.totalorder %s4007_s30, %s4007_s30 }
  0x6d   :  { %p3307_p13 = scmp.ne.s32.totalorder %s4007_s30, %s3306_s8  ;;  %p3312_p1 = scmp.lt.s32.totalorder %s3306_s8, %s3306_s8 }
  0x6f   :  { %p3313_p2 = por %p3312_p1, %p3311_p0 }
  0x71   :  { %p3314_p3 = pnand %p3313_p2, %p3307_p13 }
  0x73   :  { %3317 = shalt.err (!%p3314_p3)
}
  0x74   :  { %s4850_s2 = smov 8   ;;  %s4851_s25 = smov 128  }
  0x75   :  { %134 = dma.hbm_to_vmem [thread:$0]  %s4849_s6, 384, %s4007_s30, [#allocation15], %s4851_s25, %s4851_s25, %s4850_s2  }
  0x76   :  { %s3816_s5 = smov [#allocation17]   ;;  %s3817_s4 = smov [#allocation20]  }
  0x77   :  { %s153_s27 = sshll.u32 %s3816_s5, 4  ;;  %s173_s1 = sshll.u32 %s3817_s4, 4  ;;  %s154_s27 = int_to_ptr.vmem [resolvable:$true] %s153_s27  ;;  %s174_s1 = int_to_ptr.vmem [resolvable:$true] %s173_s1 }
  0x78   :  { %s3318_s23 = scalar_lea.hbm %s4800_s9, 16 }
  0x79   :  { %p3319_p4 = scmp.ne.s32.totalorder %s4800_s9, %s3318_s23  ;;  %p3322_p5 = scmp.lt.u32.totalorder %s3318_s23, %s4800_s9 }
  0x7b   :  { %p3324_p6 = pnand %p3322_p5, %p3319_p4 }
  0x7d   :  { %3327 = shalt.err (!%p3324_p6)
}
  0x7e   :  { %s3328_s30 = scalar_lea.vmem %s154_s27, 16  ;;  %s3332_s6 = scalar_lea.vmem %s154_s27, 32 }
  0x7f   :  { %p3329_p7 = scmp.ne.s32.totalorder %s154_s27, %s3328_s30  ;;  %p3333_p8 = scmp.lt.s32.totalorder %s154_s27, %s154_s27 }
  0x80   :  { %p3334_p9 = scmp.lt.s32.totalorder %s3332_s6, %s3328_s30 }
  0x82   :  { %p3335_p10 = por %p3334_p9, %p3333_p8 }
  0x84   :  { %p3336_p11 = pnand %p3335_p10, %p3329_p7 }
  0x86   :  { %3339 = shalt.err (!%p3336_p11)
}
  0x87   :  { %156 = dma.hbm_to_vmem [thread:$0]  %s4800_s9, 16, %s154_s27, [#allocation18]  }
  0x88   :  { %s3340_s7 = scalar_lea.hbm %s4802_s11, 16 }
  0x89   :  { %p3341_p12 = scmp.ne.s32.totalorder %s4802_s11, %s3340_s7  ;;  %p3344_p13 = scmp.lt.u32.totalorder %s3340_s7, %s4802_s11 }
  0x8b   :  { %p3346_p0 = pnand %p3344_p13, %p3341_p12 }
  0x8d   :  { %3349 = shalt.err (!%p3346_p0)
}
  0x8e   :  { %s3350_s3 = scalar_lea.vmem %s174_s1, 16  ;;  %s3354_s8 = scalar_lea.vmem %s174_s1, 32 }
  0x8f   :  { %p3351_p1 = scmp.ne.s32.totalorder %s174_s1, %s3350_s3  ;;  %p3355_p2 = scmp.lt.s32.totalorder %s174_s1, %s174_s1 }
  0x90   :  { %p3356_p3 = scmp.lt.s32.totalorder %s3354_s8, %s3350_s3 }
  0x92   :  { %p3357_p4 = por %p3356_p3, %p3355_p2 }
  0x94   :  { %p3358_p5 = pnand %p3357_p4, %p3351_p1 }
  0x96   :  { %3361 = shalt.err (!%p3358_p5)
}
  0x97   :  { %176 = dma.hbm_to_vmem [thread:$0]  %s4802_s11, 16, %s174_s1, [#allocation21]  }
  0x98   :  { %s3818_s30 = smov [#allocation23]   ;;  %s3819_s28 = smov [#allocation26]  }
  0x99   :  { %s193_s6 = sshll.u32 %s3818_s30, 4  ;;  %s214_s0 = sshll.u32 %s3819_s28, 4  ;;  %s194_s6 = int_to_ptr.vmem [resolvable:$true] %s193_s6  ;;  %s4065_s0 = int_to_ptr.vmem [resolvable:$true] %s214_s0 }
  0x9a   :  { %s3362_s7 = scalar_lea.hbm %s4804_s13, 32 }
  0x9b   :  { %p3363_p6 = scmp.ne.s32.totalorder %s4804_s13, %s3362_s7  ;;  %p3366_p7 = scmp.lt.u32.totalorder %s3362_s7, %s4804_s13 }
  0x9d   :  { %p3368_p8 = pnand %p3366_p7, %p3363_p6 }
  0x9f   :  { %3371 = shalt.err (!%p3368_p8)
}
  0xa0   :  { %s3372_s11 = scalar_lea.vmem %s194_s6, 32  ;;  %p3377_p10 = scmp.lt.s32.totalorder %s194_s6, %s194_s6 }
  0xa1   :  { %p3373_p9 = scmp.ne.s32.totalorder %s194_s6, %s3372_s11  ;;  %p3378_p11 = scmp.lt.s32.totalorder %s3372_s11, %s3372_s11 }
  0xa3   :  { %p3379_p12 = por %p3378_p11, %p3377_p10 }
  0xa5   :  { %p3380_p13 = pnand %p3379_p12, %p3373_p9 }
  0xa7   :  { %3383 = shalt.err (!%p3380_p13)
}
  0xa8   :  { %196 = dma.hbm_to_vmem [thread:$0]  %s4804_s13, 32, %s194_s6, [#allocation24]  }
  0xa9   :  { %s3384_s27 = scalar_lea.hbm %s4806_s15, 384 }
  0xaa   :  { %p3385_p0 = scmp.ne.s32.totalorder %s4806_s15, %s3384_s27  ;;  %p3388_p1 = scmp.lt.u32.totalorder %s3384_s27, %s4806_s15 }
  0xac   :  { %p3390_p2 = pnand %p3388_p1, %p3385_p0 }
  0xae   :  { %3393 = shalt.err (!%p3390_p2)
}
  0xaf   :  { %s3394_s7 = scalar_lea.vmem %s4065_s0, 384  ;;  %p3399_p4 = scmp.lt.s32.totalorder %s4065_s0, %s4065_s0 }
  0xb0   :  { %p3395_p3 = scmp.ne.s32.totalorder %s4065_s0, %s3394_s7  ;;  %p3400_p5 = scmp.lt.s32.totalorder %s3394_s7, %s3394_s7 }
  0xb2   :  { %p3401_p6 = por %p3400_p5, %p3399_p4 }
  0xb4   :  { %p3402_p7 = pnand %p3401_p6, %p3395_p3 }
  0xb6   :  { %3405 = shalt.err (!%p3402_p7)
}
  0xb7   :  { %220 = dma.hbm_to_vmem [thread:$0]  %s4806_s15, 384, %s4065_s0, [#allocation27], %s4851_s25, %s4851_s25, %s4850_s2  }
  0xb8   :  { %s3820_s26 = smov [#allocation29]   ;;  %s3821_s23 = smov [#allocation32]  }
  0xb9   :  { %s239_s22 = sshll.u32 %s3820_s26, 4  ;;  %s261_s24 = sshll.u32 %s3821_s23, 4  ;;  %s240_s22 = int_to_ptr.vmem [resolvable:$true] %s239_s22  ;;  %s262_s24 = int_to_ptr.vmem [resolvable:$true] %s261_s24 }
  0xba   :  { %s3406_s3 = scalar_lea.hbm %s4808_s17, 16 }
  0xbb   :  { %p3407_p8 = scmp.ne.s32.totalorder %s4808_s17, %s3406_s3  ;;  %p3410_p9 = scmp.lt.u32.totalorder %s3406_s3, %s4808_s17 }
  0xbd   :  { %p3412_p10 = pnand %p3410_p9, %p3407_p8 }
  0xbf   :  { %3415 = shalt.err (!%p3412_p10)
}
  0xc0   :  { %s3416_s15 = scalar_lea.vmem %s240_s22, 16  ;;  %s3420_s0 = scalar_lea.vmem %s240_s22, 32 }
  0xc1   :  { %p3417_p11 = scmp.ne.s32.totalorder %s240_s22, %s3416_s15  ;;  %p3421_p12 = scmp.lt.s32.totalorder %s240_s22, %s240_s22 }
  0xc2   :  { %p3422_p13 = scmp.lt.s32.totalorder %s3420_s0, %s3416_s15 }
  0xc4   :  { %p3423_p0 = por %p3422_p13, %p3421_p12 }
  0xc6   :  { %p3424_p1 = pnand %p3423_p0, %p3417_p11 }
  0xc8   :  { %3427 = shalt.err (!%p3424_p1)
}
  0xc9   :  { %242 = dma.hbm_to_vmem [thread:$0]  %s4808_s17, 16, %s240_s22, [#allocation30]  }
  0xca   :  { %s3428_s13 = scalar_lea.hbm %s4810_s19, 16 }
  0xcb   :  { %p3429_p2 = scmp.ne.s32.totalorder %s4810_s19, %s3428_s13  ;;  %p3432_p3 = scmp.lt.u32.totalorder %s3428_s13, %s4810_s19 }
  0xcd   :  { %p3434_p4 = pnand %p3432_p3, %p3429_p2 }
  0xcf   :  { %3437 = shalt.err (!%p3434_p4)
}
  0xd0   :  { %s3438_s1 = scalar_lea.vmem %s262_s24, 16  ;;  %s3442_s3 = scalar_lea.vmem %s262_s24, 32 }
  0xd1   :  { %p3439_p5 = scmp.ne.s32.totalorder %s262_s24, %s3438_s1  ;;  %p3443_p6 = scmp.lt.s32.totalorder %s262_s24, %s262_s24 }
  0xd2   :  { %p3444_p7 = scmp.lt.s32.totalorder %s3442_s3, %s3438_s1 }
  0xd4   :  { %p3445_p8 = por %p3444_p7, %p3443_p6 }
  0xd6   :  { %p3446_p9 = pnand %p3445_p8, %p3439_p5 }
  0xd8   :  { %3449 = shalt.err (!%p3446_p9)
}
  0xd9   :  { %264 = dma.hbm_to_vmem [thread:$0]  %s4810_s19, 16, %s262_s24, [#allocation33]  }
  0xda   :  { %s3822_s8 = smov [#allocation35]   ;;  %s3823_s27 = smov [#allocation2]  }
  0xdb   :  { %s283_s9 = sshll.u32 %s3822_s8, 4  ;;  %s48_s30 = sshll.u32 %s3823_s27, 4  ;;  %s284_s9 = int_to_ptr.vmem [resolvable:$true] %s283_s9  ;;  %s4123_s30 = int_to_ptr.vmem [resolvable:$true] %s48_s30 }
  0xdc   :  { %s3450_s28 = scalar_lea.hbm %s4812_s21, 16 }
  0xdd   :  { %p3451_p10 = scmp.ne.s32.totalorder %s4812_s21, %s3450_s28  ;;  %p3454_p11 = scmp.lt.u32.totalorder %s3450_s28, %s4812_s21 }
  0xdf   :  { %p3456_p12 = pnand %p3454_p11, %p3451_p10 }
  0xe1   :  { %3459 = shalt.err (!%p3456_p12)
}
  0xe2   :  { %s3460_s19 = scalar_lea.vmem %s284_s9, 16  ;;  %s3464_s24 = scalar_lea.vmem %s284_s9, 32 }
  0xe3   :  { %p3461_p13 = scmp.ne.s32.totalorder %s284_s9, %s3460_s19  ;;  %p3465_p0 = scmp.lt.s32.totalorder %s284_s9, %s284_s9 }
  0xe4   :  { %p3466_p1 = scmp.lt.s32.totalorder %s3464_s24, %s3460_s19 }
  0xe6   :  { %p3467_p2 = por %p3466_p1, %p3465_p0 }
  0xe8   :  { %p3468_p3 = pnand %p3467_p2, %p3461_p13 }
  0xea   :  { %3471 = shalt.err (!%p3468_p3)
}
  0xeb   :  { %286 = dma.hbm_to_vmem [thread:$0]  %s4812_s21, 16, %s284_s9, [#allocation36]  }
  0xec   :  { %s4852_s1 = sld [smem:[#allocation55_spill]] }
  0xf2   :  { %s3472_s3 = scalar_lea.hbm %s4852_s1, 1024 }
  0xf3   :  { %p3473_p4 = scmp.ne.s32.totalorder %s4852_s1, %s3472_s3  ;;  %p3476_p5 = scmp.lt.u32.totalorder %s3472_s3, %s4852_s1 }
  0xf5   :  { %p3478_p6 = pnand %p3476_p5, %p3473_p4 }
  0xf7   :  { %3481 = shalt.err (!%p3478_p6)
}
  0xf8   :  { %s3482_s15 = scalar_lea.vmem %s4123_s30, 1024  ;;  %p3487_p8 = scmp.lt.s32.totalorder %s4123_s30, %s4123_s30 }
  0xf9   :  { %p3483_p7 = scmp.ne.s32.totalorder %s4123_s30, %s3482_s15  ;;  %p3488_p9 = scmp.lt.s32.totalorder %s3482_s15, %s3482_s15 }
  0xfb   :  { %p3489_p10 = por %p3488_p9, %p3487_p8 }
  0xfd   :  { %p3490_p11 = pnand %p3489_p10, %p3483_p7 }
  0xff   :  { %3493 = shalt.err (!%p3490_p11)
}
 0x100   :  { %54 = dma.hbm_to_vmem [thread:$0]  %s4852_s1, 1024, %s4123_s30, [#allocation3], %s4851_s25, %s4851_s25, %s4850_s2  }
 0x101   :  { %s3824_s0 = smov [#allocation7]   ;;  %s3825_s5 = smov [#allocation10]  }
 0x102   :  { %s73_s28 = sshll.u32 %s3824_s0, 4  ;;  %s94_s4 = sshll.u32 %s3825_s5, 4  ;;  %s74_s28 = int_to_ptr.vmem [resolvable:$true] %s73_s28  ;;  %s4157_s4 = int_to_ptr.vmem [resolvable:$true] %s94_s4 }
 0x103   :  { %s4853_s19 = sld [smem:[#allocation57_spill]] }
 0x109   :  { %s3494_s24 = scalar_lea.hbm %s4853_s19, 128 }
 0x10a   :  { %p3495_p12 = scmp.ne.s32.totalorder %s4853_s19, %s3494_s24  ;;  %p3498_p13 = scmp.lt.u32.totalorder %s3494_s24, %s4853_s19 }
 0x10c   :  { %p3500_p0 = pnand %p3498_p13, %p3495_p12 }
 0x10e   :  { %3503 = shalt.err (!%p3500_p0)
}
 0x10f   :  { %s3504_s30 = scalar_lea.vmem %s74_s28, 128  ;;  %p3509_p2 = scmp.lt.s32.totalorder %s74_s28, %s74_s28 }
 0x110   :  { %p3505_p1 = scmp.ne.s32.totalorder %s74_s28, %s3504_s30  ;;  %p3510_p3 = scmp.lt.s32.totalorder %s3504_s30, %s3504_s30 }
 0x112   :  { %p3511_p4 = por %p3510_p3, %p3509_p2 }
 0x114   :  { %p3512_p5 = pnand %p3511_p4, %p3505_p1 }
 0x116   :  { %3515 = shalt.err (!%p3512_p5)
}
 0x117   :  { %76 = dma.hbm_to_vmem [thread:$0]  %s4853_s19, 128, %s74_s28, [#allocation6]  }
 0x118   :  { %s4854_s8 = sld [smem:[#allocation59_spill]] }
 0x11e   :  { %s3516_s27 = scalar_lea.hbm %s4854_s8, 1536 }
 0x11f   :  { %p3517_p6 = scmp.ne.s32.totalorder %s4854_s8, %s3516_s27  ;;  %p3520_p7 = scmp.lt.u32.totalorder %s3516_s27, %s4854_s8 }
 0x121   :  { %p3522_p8 = pnand %p3520_p7, %p3517_p6 }
 0x123   :  { %3525 = shalt.err (!%p3522_p8)
}
 0x124   :  { %s3526_s5 = scalar_lea.vmem %s4157_s4, 1536  ;;  %p3531_p10 = scmp.lt.s32.totalorder %s4157_s4, %s4157_s4 }
 0x125   :  { %p3527_p9 = scmp.ne.s32.totalorder %s4157_s4, %s3526_s5  ;;  %p3532_p11 = scmp.lt.s32.totalorder %s3526_s5, %s3526_s5 }
 0x127   :  { %p3533_p12 = por %p3532_p11, %p3531_p10 }
 0x129   :  { %p3534_p13 = pnand %p3533_p12, %p3527_p9 }
 0x12b   :  { %3537 = shalt.err (!%p3534_p13)
}
 0x12c   :  { %s4855_s28 = smov 384   ;;  %s3826_s19 = smov [#allocation13]  }
 0x12d   :  { %100 = dma.hbm_to_vmem [thread:$0]  %s4854_s8, 1536, %s4157_s4, [#allocation9], %s4855_s28, %s4855_s28, %s3813_s29  }
 0x12e   :  { %s116_s24 = sshll.u32 %s3826_s19, 4  ;;  %s3827_s6 = smov [#allocation16]   ;;  %s117_s24 = int_to_ptr.vmem [resolvable:$true] %s116_s24 }
 0x12f   :  { %s140_s26 = sshll.u32 %s3827_s6, 4  ;;  %s4856_s30 = sld [smem:[#allocation61_spill]]  ;;  %s4191_s26 = int_to_ptr.vmem [resolvable:$true] %s140_s26 }
 0x135   :  { %s3538_s1 = scalar_lea.hbm %s4856_s30, 2048 }
 0x136   :  { %p3539_p0 = scmp.ne.s32.totalorder %s4856_s30, %s3538_s1  ;;  %p3542_p1 = scmp.lt.u32.totalorder %s3538_s1, %s4856_s30 }
 0x138   :  { %p3544_p2 = pnand %p3542_p1, %p3539_p0 }
 0x13a   :  { %3547 = shalt.err (!%p3544_p2)
}
 0x13b   :  { %s3548_s29 = scalar_lea.vmem %s117_s24, 2048  ;;  %p3553_p4 = scmp.lt.s32.totalorder %s117_s24, %s117_s24 }
 0x13c   :  { %p3549_p3 = scmp.ne.s32.totalorder %s117_s24, %s3548_s29  ;;  %p3554_p5 = scmp.lt.s32.totalorder %s3548_s29, %s3548_s29 }
 0x13e   :  { %p3555_p6 = por %p3554_p5, %p3553_p4 }
 0x140   :  { %p3556_p7 = pnand %p3555_p6, %p3549_p3 }
 0x142   :  { %3559 = shalt.err (!%p3556_p7)
}
 0x143   :  { %122 = dma.hbm_to_vmem [thread:$0]  %s4856_s30, 2048, %s117_s24, [#allocation12], %s4851_s25, %s4851_s25, %s4850_s2  }
 0x144   :  { %s4857_s9 = sld [smem:[#allocation63_spill]] }
 0x14a   :  { %s3560_s0 = scalar_lea.hbm %s4857_s9, 512 }
 0x14b   :  { %p3561_p8 = scmp.ne.s32.totalorder %s4857_s9, %s3560_s0  ;;  %p3564_p9 = scmp.lt.u32.totalorder %s3560_s0, %s4857_s9 }
 0x14d   :  { %p3566_p10 = pnand %p3564_p9, %p3561_p8 }
 0x14f   :  { %3569 = shalt.err (!%p3566_p10)
}
 0x150   :  { %s3570_s19 = scalar_lea.vmem %s4191_s26, 512  ;;  %p3575_p12 = scmp.lt.s32.totalorder %s4191_s26, %s4191_s26 }
 0x151   :  { %p3571_p11 = scmp.ne.s32.totalorder %s4191_s26, %s3570_s19  ;;  %p3576_p13 = scmp.lt.s32.totalorder %s3570_s19, %s3570_s19 }
 0x153   :  { %p3577_p0 = por %p3576_p13, %p3575_p12 }
 0x155   :  { %p3578_p1 = pnand %p3577_p0, %p3571_p11 }
 0x157   :  { %3581 = shalt.err (!%p3578_p1)
}
 0x158   :  { %146 = dma.hbm_to_vmem [thread:$0]  %s4857_s9, 512, %s4191_s26, [#allocation15], %s4851_s25, %s4851_s25, %s4850_s2  }
 0x159   :  { %s3828_s23 = smov [#allocation19]   ;;  %s3829_s30 = smov [#allocation22]  }
 0x15a   :  { %s163_s11 = sshll.u32 %s3828_s23, 4  ;;  %s183_s1 = sshll.u32 %s3829_s30, 4  ;;  %s164_s11 = int_to_ptr.vmem [resolvable:$true] %s163_s11  ;;  %s184_s1 = int_to_ptr.vmem [resolvable:$true] %s183_s1 }
 0x15b   :  { %s3582_s22 = scalar_lea.hbm %s4801_s10, 32 }
 0x15c   :  { %p3583_p2 = scmp.ne.s32.totalorder %s4801_s10, %s3582_s22  ;;  %p3586_p3 = scmp.lt.u32.totalorder %s3582_s22, %s4801_s10 }
 0x15e   :  { %p3588_p4 = pnand %p3586_p3, %p3583_p2 }
 0x160   :  { %3591 = shalt.err (!%p3588_p4)
}
 0x161   :  { %s3592_s26 = scalar_lea.vmem %s164_s11, 32  ;;  %p3597_p6 = scmp.lt.s32.totalorder %s164_s11, %s164_s11 }
 0x162   :  { %p3593_p5 = scmp.ne.s32.totalorder %s164_s11, %s3592_s26  ;;  %p3598_p7 = scmp.lt.s32.totalorder %s3592_s26, %s3592_s26 }
 0x164   :  { %p3599_p8 = por %p3598_p7, %p3597_p6 }
 0x166   :  { %p3600_p9 = pnand %p3599_p8, %p3593_p5 }
 0x168   :  { %3603 = shalt.err (!%p3600_p9)
}
 0x169   :  { %166 = dma.hbm_to_vmem [thread:$0]  %s4801_s10, 32, %s164_s11, [#allocation18]  }
 0x16a   :  { %s3604_s5 = scalar_lea.hbm %s4803_s12, 64 }
 0x16b   :  { %p3605_p10 = scmp.ne.s32.totalorder %s4803_s12, %s3604_s5  ;;  %p3608_p11 = scmp.lt.u32.totalorder %s3604_s5, %s4803_s12 }
 0x16d   :  { %p3610_p12 = pnand %p3608_p11, %p3605_p10 }
 0x16f   :  { %3613 = shalt.err (!%p3610_p12)
}
 0x170   :  { %s3614_s24 = scalar_lea.vmem %s184_s1, 64  ;;  %p3619_p0 = scmp.lt.s32.totalorder %s184_s1, %s184_s1 }
 0x171   :  { %p3615_p13 = scmp.ne.s32.totalorder %s184_s1, %s3614_s24  ;;  %p3620_p1 = scmp.lt.s32.totalorder %s3614_s24, %s3614_s24 }
 0x173   :  { %p3621_p2 = por %p3620_p1, %p3619_p0 }
 0x175   :  { %p3622_p3 = pnand %p3621_p2, %p3615_p13 }
 0x177   :  { %3625 = shalt.err (!%p3622_p3)
}
 0x178   :  { %186 = dma.hbm_to_vmem [thread:$0]  %s4803_s12, 64, %s184_s1, [#allocation21]  }
 0x179   :  { %s3830_s23 = smov [#allocation25]   ;;  %s3831_s30 = smov [#allocation28]  }
 0x17a   :  { %s202_s11 = sshll.u32 %s3830_s23, 4  ;;  %s226_s3 = sshll.u32 %s3831_s30, 4  ;;  %s203_s11 = int_to_ptr.vmem [resolvable:$true] %s202_s11  ;;  %s4252_s3 = int_to_ptr.vmem [resolvable:$true] %s226_s3 }
 0x17b   :  { %s3626_s27 = scalar_lea.hbm %s4805_s14, 2048 }
 0x17c   :  { %p3627_p4 = scmp.ne.s32.totalorder %s4805_s14, %s3626_s27  ;;  %p3630_p5 = scmp.lt.u32.totalorder %s3626_s27, %s4805_s14 }
 0x17e   :  { %p3632_p6 = pnand %p3630_p5, %p3627_p4 }
 0x180   :  { %3635 = shalt.err (!%p3632_p6)
}
 0x181   :  { %s3636_s12 = scalar_lea.vmem %s203_s11, 2048  ;;  %p3641_p8 = scmp.lt.s32.totalorder %s203_s11, %s203_s11 }
 0x182   :  { %p3637_p7 = scmp.ne.s32.totalorder %s203_s11, %s3636_s12  ;;  %p3642_p9 = scmp.lt.s32.totalorder %s3636_s12, %s3636_s12 }
 0x184   :  { %p3643_p10 = por %p3642_p9, %p3641_p8 }
 0x186   :  { %p3644_p11 = pnand %p3643_p10, %p3637_p7 }
 0x188   :  { %3647 = shalt.err (!%p3644_p11)
}
 0x189   :  { %208 = dma.hbm_to_vmem [thread:$0]  %s4805_s14, 2048, %s203_s11, [#allocation24], %s4851_s25, %s4851_s25, %s4850_s2  }
 0x18a   :  { %s3648_s0 = scalar_lea.hbm %s4807_s16, 512 }
 0x18b   :  { %p3649_p12 = scmp.ne.s32.totalorder %s4807_s16, %s3648_s0  ;;  %p3652_p13 = scmp.lt.u32.totalorder %s3648_s0, %s4807_s16 }
 0x18d   :  { %p3654_p0 = pnand %p3652_p13, %p3649_p12 }
 0x18f   :  { %3657 = shalt.err (!%p3654_p0)
}
 0x190   :  { %s3658_s19 = scalar_lea.vmem %s4252_s3, 512  ;;  %p3663_p2 = scmp.lt.s32.totalorder %s4252_s3, %s4252_s3 }
 0x191   :  { %p3659_p1 = scmp.ne.s32.totalorder %s4252_s3, %s3658_s19  ;;  %p3664_p3 = scmp.lt.s32.totalorder %s3658_s19, %s3658_s19 }
 0x193   :  { %p3665_p4 = por %p3664_p3, %p3663_p2 }
 0x195   :  { %p3666_p5 = pnand %p3665_p4, %p3659_p1 }
 0x197   :  { %3669 = shalt.err (!%p3666_p5)
}
 0x198   :  { %232 = dma.hbm_to_vmem [thread:$0]  %s4807_s16, 512, %s4252_s3, [#allocation27], %s4851_s25, %s4851_s25, %s4850_s2  }
 0x199   :  { %s3832_s10 = smov [#allocation31]   ;;  %s3833_s23 = smov [#allocation34]  }
 0x19a   :  { %s248_s6 = sshll.u32 %s3832_s10, 4  ;;  %s270_s11 = sshll.u32 %s3833_s23, 4  ;;  %s249_s6 = int_to_ptr.vmem [resolvable:$true] %s248_s6  ;;  %s4289_s11 = int_to_ptr.vmem [resolvable:$true] %s270_s11 }
 0x19b   :  { %s3670_s22 = scalar_lea.hbm %s4809_s18, 768 }
 0x19c   :  { %p3671_p6 = scmp.ne.s32.totalorder %s4809_s18, %s3670_s22  ;;  %p3674_p7 = scmp.lt.u32.totalorder %s3670_s22, %s4809_s18 }
 0x19e   :  { %p3676_p8 = pnand %p3674_p7, %p3671_p6 }
 0x1a0   :  { %3679 = shalt.err (!%p3676_p8)
}
 0x1a1   :  { %s3680_s16 = scalar_lea.vmem %s249_s6, 768  ;;  %p3685_p10 = scmp.lt.s32.totalorder %s249_s6, %s249_s6 }
 0x1a2   :  { %p3681_p9 = scmp.ne.s32.totalorder %s249_s6, %s3680_s16  ;;  %p3686_p11 = scmp.lt.s32.totalorder %s3680_s16, %s3680_s16 }
 0x1a4   :  { %p3687_p12 = por %p3686_p11, %p3685_p10 }
 0x1a6   :  { %p3688_p13 = pnand %p3687_p12, %p3681_p9 }
 0x1a8   :  { %3691 = shalt.err (!%p3688_p13)
}
 0x1a9   :  { %254 = dma.hbm_to_vmem [thread:$0]  %s4809_s18, 768, %s249_s6, [#allocation30], %s4851_s25, %s4851_s25, %s4850_s2  }
 0x1aa   :  { %s3692_s15 = scalar_lea.hbm %s4811_s20, 384 }
 0x1ab   :  { %p3693_p0 = scmp.ne.s32.totalorder %s4811_s20, %s3692_s15  ;;  %p3696_p1 = scmp.lt.u32.totalorder %s3692_s15, %s4811_s20 }
 0x1ad   :  { %p3698_p2 = pnand %p3696_p1, %p3693_p0 }
 0x1af   :  { %3701 = shalt.err (!%p3698_p2)
}
 0x1b0   :  { %s3702_s28 = scalar_lea.vmem %s4289_s11, 384  ;;  %p3707_p4 = scmp.lt.s32.totalorder %s4289_s11, %s4289_s11 }
 0x1b1   :  { %p3703_p3 = scmp.ne.s32.totalorder %s4289_s11, %s3702_s28  ;;  %p3708_p5 = scmp.lt.s32.totalorder %s3702_s28, %s3702_s28 }
 0x1b3   :  { %p3709_p6 = por %p3708_p5, %p3707_p4 }
 0x1b5   :  { %p3710_p7 = pnand %p3709_p6, %p3703_p3 }
 0x1b7   :  { %3713 = shalt.err (!%p3710_p7)
}
 0x1b8   :  { %276 = dma.hbm_to_vmem [thread:$0]  %s4811_s20, 384, %s4289_s11, [#allocation33], %s4851_s25, %s4851_s25, %s4850_s2  }
 0x1b9   :  { %s3834_s13 = smov [#allocation37]   ;;  %s3835_s14 = smov [#allocation38]  }
 0x1ba   :  { %s292_s19 = sshll.u32 %s3834_s13, 4  ;;  %s305_s24 = sshll.u32 %s3835_s14, 4  ;;  %s293_s19 = int_to_ptr.vmem [resolvable:$true] %s292_s19  ;;  %s306_s24 = int_to_ptr.vmem [resolvable:$true] %s305_s24 }
 0x1bb   :  { %s4858_s23 = sld [smem:[#allocation64_spill]] }
 0x1c1   :  { %s3714_s30 = scalar_lea.hbm %s4858_s23, 256 }
 0x1c2   :  { %p3715_p8 = scmp.ne.s32.totalorder %s4858_s23, %s3714_s30  ;;  %p3718_p9 = scmp.lt.u32.totalorder %s3714_s30, %s4858_s23 }
 0x1c4   :  { %p3720_p10 = pnand %p3718_p9, %p3715_p8 }
 0x1c6   :  { %3723 = shalt.err (!%p3720_p10)
}
 0x1c7   :  { %s3724_s20 = scalar_lea.vmem %s293_s19, 256  ;;  %p3729_p12 = scmp.lt.s32.totalorder %s293_s19, %s293_s19 }
 0x1c8   :  { %p3725_p11 = scmp.ne.s32.totalorder %s293_s19, %s3724_s20  ;;  %p3730_p13 = scmp.lt.s32.totalorder %s3724_s20, %s3724_s20 }
 0x1ca   :  { %p3731_p0 = por %p3730_p13, %p3729_p12 }
 0x1cc   :  { %p3732_p1 = pnand %p3731_p0, %p3725_p11 }
 0x1ce   :  { %3735 = shalt.err (!%p3732_p1)
}
 0x1cf   :  { %298 = dma.hbm_to_vmem [thread:$0]  %s4858_s23, 256, %s293_s19, [#allocation36], %s4851_s25, %s4851_s25, %s4850_s2  }
 0x1d0   :  { %s4859_s3 = sld [smem:[#allocation65_spill]] }
 0x1d6   :  { %s3736_s26 = scalar_lea.hbm %s4859_s3, 16 }
 0x1d7   :  { %p3737_p2 = scmp.ne.s32.totalorder %s4859_s3, %s3736_s26  ;;  %p3740_p3 = scmp.lt.u32.totalorder %s3736_s26, %s4859_s3 }
 0x1d9   :  { %p3742_p4 = pnand %p3740_p3, %p3737_p2 }
 0x1db   :  { %3745 = shalt.err (!%p3742_p4)
}
 0x1dc   :  { %s3746_s9 = scalar_lea.vmem %s306_s24, 16  ;;  %s3750_s0 = scalar_lea.vmem %s306_s24, 32 }
 0x1dd   :  { %p3747_p5 = scmp.ne.s32.totalorder %s306_s24, %s3746_s9  ;;  %p3751_p6 = scmp.lt.s32.totalorder %s306_s24, %s306_s24 }
 0x1de   :  { %p3752_p7 = scmp.lt.s32.totalorder %s3750_s0, %s3746_s9 }
 0x1e0   :  { %p3753_p8 = por %p3752_p7, %p3751_p6 }
 0x1e2   :  { %p3754_p9 = pnand %p3753_p8, %p3747_p5 }
 0x1e4   :  { %3757 = shalt.err (!%p3754_p9)
}
 0x1e5   :  { %308 = dma.hbm_to_vmem [thread:$0]  %s4859_s3, 16, %s306_s24, [#allocation39]  }
 0x1e6   :  { %3780 = dma.done.wait [#allocation3], 1024  }
 0x1e7   :  { %3781 = vsyncadd [#allocation3], 4294966272 }
 0x1e8   :  { %3782 = dma.done.wait [#allocation6], 1152  }
 0x1e9   :  { %3783 = vsyncadd [#allocation6], 4294966144 }
 0x1ea   :  { %3784 = dma.done.wait [#allocation9], 2688  }
 0x1eb   :  { %3785 = vsyncadd [#allocation9], 4294964608 }
 0x1ec   :  { %3786 = dma.done.wait [#allocation12], 2096  }
 0x1ed   :  { %3787 = vsyncadd [#allocation12], 4294965200 }
 0x1ee   :  { %3788 = dma.done.wait [#allocation15], 896  }
 0x1ef   :  { %3789 = vsyncadd [#allocation15], 4294966400 }
 0x1f0   :  { %3790 = dma.done.wait [#allocation18], 48  }
 0x1f1   :  { %3791 = vsyncadd [#allocation18], 4294967248 }
 0x1f2   :  { %3792 = dma.done.wait [#allocation21], 80  }
 0x1f3   :  { %3793 = vsyncadd [#allocation21], 4294967216 }
 0x1f4   :  { %3794 = dma.done.wait [#allocation24], 2080  }
 0x1f5   :  { %3795 = vsyncadd [#allocation24], 4294965216 }
 0x1f6   :  { %3796 = dma.done.wait [#allocation27], 896  }
 0x1f7   :  { %3797 = vsyncadd [#allocation27], 4294966400 }
 0x1f8   :  { %3798 = dma.done.wait [#allocation30], 784  }
 0x1f9   :  { %3799 = vsyncadd [#allocation30], 4294966512 }
 0x1fa   :  { %3800 = dma.done.wait [#allocation33], 400  }
 0x1fb   :  { %3801 = vsyncadd [#allocation33], 4294966896 }
 0x1fc   :  { %3802 = dma.done.wait [#allocation36], 272  }
 0x1fd   :  { %3803 = vsyncadd [#allocation36], 4294967024 }
 0x1fe   :  { %3804 = dma.done.wait [#allocation39], 16  }
 0x1ff   :  { %3805 = vsyncadd [#allocation39], 4294967280  ;;  %v3836_v0 = vmov 0.0   ;;  %vm560_vm0 = vcmask 1042432   ;;  %v3837_v1 = vmov 0   ;;  %vm4833_vm1 = vmmov 1  }
 0x200   :  { %634 = vmatprep.mubr.f32.mxu0 %v3836_v0  ;;  %3168 = vset.pattern.permute.xlu0 %v3837_v1  ;;  %vm4356_vm2 = vmpackc.low %vm560_vm0, %vm4833_vm1  ;;  %v524_v3 = vld [vmem:[#allocation10 + $0x8] sm:$0xff]  ;;  %v527_v4 = vld [vmem:[#allocation10 + $0x20] sm:$0xff]  ;;  %v398_v10 = vlaneseq  ;;  %v3839_v11 = vmov 1966171168   ;;  %vm535_vm3 = vcmask 220160   ;;  %vm813_vm4 = vcmask 1043456  }
 0x201   :  { %3179 = vset.pattern.permute.xlu1 %v3837_v1  ;;  %v523_v5 = vld [vmem:[#allocation10] sm:$0xff]  ;;  %v2994_v6 = vpack.c.bf16 %v527_v4, %v524_v3  ;;  %v526_v7 = vld [vmem:[#allocation10 + $0x18] sm:$0xff]  ;;  %v533_v9 = vld [vmem:[#allocation10 + $0x50] sm:$0x7]  ;;  %v405_v12 = vunpack.c.l.s4 %v3839_v11  ;;  %vm788_vm13 = vcmask 162816   ;;  %vm1242_vm14 = vcmask 1041409  }
 0x202   :  { %v530_v8 = vld [vmem:[#allocation10 + $0x38] sm:$0xff]  ;;  %v2996_v13 = vpack.c.bf16 %v526_v7, %v523_v5  ;;  %v529_v15 = vld [vmem:[#allocation10 + $0x30] sm:$0xff]  ;;  %v532_v16 = vld [vmem:[#allocation10 + $0x48] sm:$0x7]  ;;  %v4367_v24 = vshrl.u32 %v398_v10, 7  ;;  %vm1244_vm15 = vcmask 1042434  }
 0x203   :  { %v2998_v14 = vpack.c.bf16 %v533_v9, %v530_v8  ;;  %v4360_v17 = vld [vmem:[#allocation5] sm:$0xff]  ;;  %2995 = vmatprep.subr.bf16.mxu0 %v2994_v6  ;;  %v515_v18 = vld [vmem:[#allocation8 + $0x8] sm:$0xff]  ;;  %v518_v19 = vld [vmem:[#allocation8 + $0x20] sm:$0xff]  ;;  %v3001_v20 = vpack.c.bf16 %v532_v16, %v529_v15  ;;  %v406_v25 = vunpack.c.0.s8 %v405_v12  ;;  %vm1782_vm1 = vcmask 23552   ;;  %s3843_s5 = smov 124   ;;  %s3844_s28 = smov [#allocation40]  }
 0x204   :  { %2808 = vmatprep.mubr.msk.f32.mxu1 %vm535_vm3, %v4360_v17  ;;  %2997 = vmatpush1.bf16.msra.mxu0 %v2996_v13  ;;  %v3014_v21 = vpack.c.bf16 %v518_v19, %v515_v18  ;;  %v514_v22 = vld [vmem:[#allocation8] sm:$0xff]  ;;  %v517_v23 = vld [vmem:[#allocation8 + $0x18] sm:$0xff]  ;;  %v520_v32 = vld [vmem:[#allocation8 + $0x30] sm:$0xf]  ;;  %v4382_v34 = vsub.s32 0, %v4367_v24  ;;  %s2610_s18 = sshll.u32 %s3844_s28, 4  ;;  %s2611_s18 = int_to_ptr.vmem [resolvable:$true] %s2610_s18 }
 0x205   :  { %3000 = vmatprep.subr.msk.bf16.mxu0 %vm4356_vm2, %v2998_v14  ;;  %v3016_v26 = vpack.c.bf16 %v517_v23, %v514_v22  ;;  %v409_v27 = vsub.s32 %v406_v25, %v4367_v24  ;;  %v521_v28 = vld [vmem:[#allocation8 + $0x38] sm:$0xf]  ;;  %v4377_v31 = vld [vmem:[#allocation5 + $0x8] sm:$0xff]  ;;  %v4389_v39 = vld [vmem:[#allocation5 + $0x10] sm:$0xff]  ;;  %s3758_s7 = scalar_lea.vmem %s2611_s18, 128  ;;  %p3763_p11 = scmp.lt.s32.totalorder %s2611_s18, %s2611_s18 }
 0x206   :  { %v397_v29 = vld [vmem:[#allocation7] sm:$0xff]  ;;  %v4399_v48 = vld [vmem:[#allocation5 + $0x18] sm:$0xff]  ;;  %v4428_v6 = vld [vmem:[#allocation5 + $0x28] sm:$0xff]  ;;  %p3759_p10 = scmp.ne.s32.totalorder %s2611_s18, %s3758_s7  ;;  %p3764_p12 = scmp.lt.s32.totalorder %s3758_s7, %s3758_s7 }
 0x207   :  { %v4374_v30 = vadd.s32 4294967295, %v397_v29  ;;  %v4415_v60 = vld [vmem:[#allocation5 + $0x20] sm:$0xff]  ;;  %v4434_v9 = vld [vmem:[#allocation5 + $0x30] sm:$0xff]  ;;  %v4439_v11 = vld [vmem:[#allocation5 + $0x38] sm:$0xff] }
 0x208   :  { %3003 = vmatpush1.bf16.msk.msra.mxu0 %vm4356_vm2, %v3001_v20  ;;  %v4444_v12 = vld [vmem:[#allocation2] sm:$0xff]  ;;  %v4449_v13 = vld [vmem:[#allocation2 + $0x8] sm:$0xff]  ;;  %v4454_v14 = vld [vmem:[#allocation2 + $0x10] sm:$0xff]  ;;  %p3765_p13 = por %p3764_p12, %p3763_p11 }
 0x209   :  { %3015 = vmatprep.subr.bf16.mxu0 %v3014_v21  ;;  %v410_v33 = vrot.slane %v4374_v30, %v409_v27  ;;  %v403_v35 = vcombine.high %v4374_v30, %v4374_v30  ;;  %v4459_v15 = vld [vmem:[#allocation2 + $0x18] sm:$0xff]  ;;  %v4464_v16 = vld [vmem:[#allocation2 + $0x20] sm:$0xff]  ;;  %v4469_v18 = vld [vmem:[#allocation2 + $0x28] sm:$0xff] }
 0x20a   :  { %v4474_v19 = vld [vmem:[#allocation2 + $0x30] sm:$0xff]  ;;  %v4479_v20 = vld [vmem:[#allocation2 + $0x38] sm:$0xff]  ;;  %p3766_p0 = pnand %p3765_p13, %p3759_p10 }
 0x20b   :  { %2643 = vmatmul.mubr.msk.f32.vlgmr.msra.gmra.mrb[0].mxu0 %vm535_vm3, %v4360_v17  ;;  %v418_v36 = vcombine.high %v410_v33, %v410_v33  ;;  %v426_v37 = vrot.slane %v410_v33, %v409_v27  ;;  %v417_v38 = vrot.slane %v403_v35, %v409_v27  ;;  %v4483_v21 = vld [vmem:[#allocation11] sm:$0x7] }
 0x20c   :  { %3017 = vmatpush1.bf16.msra.mxu0 %v3016_v26  ;;  %640 = vmatprep.mubr.f32.mxu0 %v3836_v0  ;;  %v4487_v23 = vrot.slane %v4483_v21, %v4382_v34 }
 0x20d   :  { %2660 = vmatprep.subr.msk.mxu0 %vm813_vm4, %v521_v28  ;;  %v440_v40 = vrot.slane %v418_v36, %v409_v27  ;;  %v448_v41 = vcombine.high %v426_v37, %v426_v37  ;;  %v455_v42 = vrot.slane %v426_v37, %v4382_v34  ;;  %v419_v43 = vcombine.high %v417_v38, %v417_v38 }
 0x20e   :  { %v433_v44 = vrot.slane %v417_v38, %v409_v27 }
 0x20f   :  { %2644 = vmatmul.mubr.msk.f32.gmra.mrb[2].mxu0 %vm535_vm3, %v4377_v31  ;;  %v459_v45 = vrot.slane %v440_v40, %v4382_v34  ;;  %vm484_vm5 = vcmp.eq.s32.totalorder %v4367_v24, %v455_v42  ;;  %v450_v46 = vcombine.high %v440_v40, %v440_v40  ;;  %v463_v47 = vrot.slane %v448_v41, %v4382_v34 }
 0x210   :  { %646 = vmatprep.mubr.f32.mxu0 %v3836_v0  ;;  %2661 = vmatpush1.msk.msra.mxu0 %vm813_vm4, %v520_v32  ;;  %v2632_v49 = vsel %vm484_vm5, 1.0, %v3836_v0  ;;  %v447_v50 = vrot.slane %v419_v43, %v409_v27  ;;  %v449_v51 = vcombine.high %v433_v44, %v433_v44  ;;  %v471_v52 = vrot.slane %v433_v44, %v4382_v34 }
 0x211   :  { %vm485_vm6 = vcmp.eq.s32.totalorder %v4367_v24, %v459_v45  ;;  %v467_v53 = vrot.slane %v450_v46, %v4382_v34  ;;  %vm486_vm7 = vcmp.eq.s32.totalorder %v4367_v24, %v463_v47  ;;  %v1049_v40 = vsub.s32 1, %v4367_v24 }
 0x212   :  { %v2633_v54 = vsel %vm485_vm6, 1.0, %v3836_v0  ;;  %v2634_v55 = vsel %vm486_vm7, 1.0, %v3836_v0  ;;  %v475_v56 = vrot.slane %v447_v50, %v4382_v34  ;;  %vm488_vm8 = vcmp.eq.s32.totalorder %v4367_v24, %v471_v52 }
 0x213   :  { %2645 = vmatmul.mubr.msk.f32.gmra.mrb[4].mxu0 %vm535_vm3, %v4389_v39  ;;  %v3169_v57 = vpack.i.bf16 %v2633_v54, %v2632_v49  ;;  %vm487_vm9 = vcmp.eq.s32.totalorder %v4367_v24, %v467_v53  ;;  %v2636_v58 = vsel %vm488_vm8, 1.0, %v3836_v0  ;;  %v451_v59 = vcombine.high %v447_v50, %v447_v50 }
 0x214   :  { %652 = vmatprep.mubr.f32.mxu0 %v3836_v0  ;;  %v2635_v61 = vsel %vm487_vm9, 1.0, %v3836_v0  ;;  %vm489_vm10 = vcmp.eq.s32.totalorder %v4367_v24, %v475_v56  ;;  %v479_v62 = vrot.slane %v449_v51, %v4382_v34  ;;  %v4496_v50 = vrot.slane %v4483_v21, %v1049_v40 }
 0x215   :  { %3170 = vperm.xlu0 %3168, %v3169_v57   ;;  %v3174_v63 = vpack.i.bf16 %v2635_v61, %v2634_v55  ;;  %v2637_v1 = vsel %vm489_vm10, 1.0, %v3836_v0  ;;  %v483_v3 = vrot.slane %v451_v59, %v4382_v34  ;;  %vm1246_vm5 = vcmask 1043459  }
 0x216   :  { %v3180_v4 = vpack.i.bf16 %v2637_v1, %v2636_v58  ;;  %vm490_vm11 = vcmp.eq.s32.totalorder %v4367_v24, %v479_v62  ;;  %vm1248_vm6 = vcmask 1044484   ;;  %vm1250_vm7 = vcmask 1045509  }
 0x217   :  { %2646 = vmatmul.mubr.msk.f32.gmra.mrb[6].mxu0 %vm535_vm3, %v4399_v48  ;;  %vm491_vm12 = vcmp.eq.s32.totalorder %v4367_v24, %v483_v3  ;;  %v2638_v5 = vsel %vm490_vm11, 1.0, %v3836_v0  ;;  %vm1252_vm8 = vcmask 1046534   ;;  %vm1254_vm9 = vcmask 1047559  }
 0x218   :  { %658 = vmatprep.mubr.f32.mxu0 %v3836_v0  ;;  %3181 = vperm.xlu1 %3179, %v3180_v4   ;;  %v2639_v7 = vsel %vm491_vm12, 1.0, %v3836_v0  ;;  %vm1258_vm10 = vcmask 64512   ;;  %vm3841_vm12 = vmmov 0  }
 0x219   :  { %3175 = vperm.xlu0 %3168, %v3174_v63   ;;  %v3185_v8 = vpack.i.bf16 %v2639_v7, %v2638_v5 }
 0x21b   :  { %2647 = vmatmul.mubr.msk.f32.gmra.mrb[8].mxu0 %vm535_vm3, %v4415_v60 }
 0x21c   :  { %664 = vmatprep.mubr.f32.mxu0 %v3836_v0  ;;  %3186 = vperm.xlu1 %3179, %v3185_v8  }
 0x21f   :  { %2648 = vmatmul.mubr.msk.f32.gmra.mrb[10].mxu0 %vm535_vm3, %v4428_v6 }
 0x220   :  { %670 = vmatprep.mubr.f32.mxu0 %v3836_v0 }
 0x223   :  { %2649 = vmatmul.mubr.msk.f32.gmra.mrb[12].mxu0 %vm535_vm3, %v4434_v9 }
 0x224   :  { %676 = vmatprep.mubr.f32.mxu0 %v3836_v0 }
 0x227   :  { %2650 = vmatmul.mubr.msk.f32.gmra.mrb[14].mxu0 %vm535_vm3, %v4439_v11 }
 0x228   :  { %887 = vmatprep.mubr.f32.mxu0 %v3836_v0 }
 0x22b   :  { %2662 = vmatmul.mubr.msk.f32.vlgmr.msra.gmra.mrb[0].mxu0 %vm788_vm13, %v4444_v12 }
 0x22c   :  { %893 = vmatprep.mubr.f32.mxu0 %v3836_v0 }
 0x22f   :  { %2663 = vmatmul.mubr.msk.f32.gmra.mrb[2].mxu0 %vm788_vm13, %v4449_v13 }
 0x230   :  { %899 = vmatprep.mubr.f32.mxu0 %v3836_v0 }
 0x233   :  { %2664 = vmatmul.mubr.msk.f32.gmra.mrb[4].mxu0 %vm788_vm13, %v4454_v14 }
 0x234   :  { %905 = vmatprep.mubr.f32.mxu0 %v3836_v0 }
 0x237   :  { %2665 = vmatmul.mubr.msk.f32.gmra.mrb[6].mxu0 %vm788_vm13, %v4459_v15 }
 0x238   :  { %911 = vmatprep.mubr.f32.mxu0 %v3836_v0 }
 0x23b   :  { %2666 = vmatmul.mubr.msk.f32.gmra.mrb[8].mxu0 %vm788_vm13, %v4464_v16 }
 0x23c   :  { %917 = vmatprep.mubr.f32.mxu0 %v3836_v0 }
 0x23f   :  { %2667 = vmatmul.mubr.msk.f32.gmra.mrb[10].mxu0 %vm788_vm13, %v4469_v18 }
 0x240   :  { %923 = vmatprep.mubr.f32.mxu0 %v3836_v0 }
 0x243   :  { %2668 = vmatmul.mubr.msk.f32.gmra.mrb[12].mxu0 %vm788_vm13, %v4474_v19 }
 0x244   :  { %929 = vmatprep.mubr.f32.mxu0 %v3836_v0 }
 0x247   :  { %2669 = vmatmul.mubr.msk.f32.gmra.mrb[14].mxu0 %vm788_vm13, %v4479_v20 }
 0x248   :  { %2879 = vmatprep.mubr.msk.f32.mxu0 %vm3841_vm12, %v3836_v0 }
 0x294   :  { %v3171_v22 = vpop.permute.xlu0 %3170 }
 0x295   :  { %v3172_v25 = vunpack.i.l.bf16 %v3171_v22  ;;  %v3173_v29 = vunpack.i.h.bf16 %v3171_v22 }
 0x297   :  { %v3182_v54 = vpop.permute.xlu1 %3181 }
 0x298   :  { %v3176_v35 = vpop.permute.xlu0 %3175  ;;  %v3183_v1 = vunpack.i.l.bf16 %v3182_v54 }
 0x299   :  { %v3177_v43 = vunpack.i.l.bf16 %v3176_v35  ;;  %v3178_v52 = vunpack.i.h.bf16 %v3176_v35  ;;  %v3184_v35 = vunpack.i.h.bf16 %v3182_v54 }
 0x2fe   :  { %v889_v26 = vpop.f32.mrb[0].mxu0 }
 0x2ff   :  { %v1058_v27 = vadd.f32 %v4487_v23, %v889_v26  ;;  %v891_v28 = vpop.f32.mrb[1].mxu0 }
 0x300   :  { %v1059_v63 = vadd.f32 %v4496_v50, %v891_v28 }
 0x301   :  { %v1122_v32 = vmul.f32 %v3172_v25, %v1058_v27 }
 0x302   :  { %v895_v33 = vpop.f32.mrb[2].mxu0 }
 0x303   :  { %v1130_v36 = vrot.slane %v1122_v32, 4  ;;  %v1061_v37 = vadd.f32 %v4487_v23, %v895_v33  ;;  %v897_v38 = vpop.f32.mrb[3].mxu0 }
 0x304   :  { %v1062_v28 = vadd.f32 %v4496_v50, %v897_v38 }
 0x305   :  { %v1131_v41 = vadd.f32 %v1130_v36, %v1122_v32  ;;  %v1123_v42 = vmul.f32 %v3173_v29, %v1061_v37 }
 0x306   :  { %v901_v44 = vpop.f32.mrb[4].mxu0 }
 0x307   :  { %v1132_v45 = vrot.slane %v1131_v41, 2  ;;  %v1136_v46 = vrot.slane %v1123_v42, 4  ;;  %v1064_v47 = vadd.f32 %v4487_v23, %v901_v44  ;;  %v903_v49 = vpop.f32.mrb[5].mxu0 }
 0x309   :  { %v1137_v51 = vadd.f32 %v1136_v46, %v1123_v42  ;;  %v1124_v53 = vmul.f32 %v3177_v43, %v1064_v47  ;;  %v1133_v55 = vadd.f32 %v1132_v45, %v1131_v41  ;;  %v3187_v47 = vpop.permute.xlu1 %3186 }
 0x30a   :  { %v907_v56 = vpop.f32.mrb[6].mxu0 }
 0x30b   :  { %v1138_v57 = vrot.slane %v1137_v51, 2  ;;  %v1142_v58 = vrot.slane %v1124_v53, 4  ;;  %v1067_v59 = vadd.f32 %v4487_v23, %v907_v56  ;;  %v909_v61 = vpop.f32.mrb[7].mxu0  ;;  %v1134_v62 = vrot.slane %v1133_v55, 1 }
 0x30d   :  { %v1143_v3 = vadd.f32 %v1142_v58, %v1124_v53  ;;  %v1125_v4 = vmul.f32 %v3178_v52, %v1067_v59  ;;  %v1135_v5 = vadd.f32 %v1134_v62, %v1133_v55  ;;  %v1139_v7 = vadd.f32 %v1138_v57, %v1137_v51 }
 0x30e   :  { %v913_v8 = vpop.f32.mrb[8].mxu0  ;;  %v1065_v52 = vadd.f32 %v4496_v50, %v903_v49  ;;  %v3188_v58 = vunpack.i.l.bf16 %v3187_v47  ;;  %v1068_v49 = vadd.f32 %v4496_v50, %v909_v61 }
 0x30f   :  { %v1144_v22 = vrot.slane %v1143_v3, 2  ;;  %v1148_v25 = vrot.slane %v1125_v4, 4  ;;  %v1070_v26 = vadd.f32 %v4487_v23, %v913_v8  ;;  %v915_v27 = vpop.f32.mrb[9].mxu0  ;;  %v1178_v29 = vmul.f32 %v1135_v5, %v1059_v63 }
 0x310   :  { %v1140_v32 = vrot.slane %v1139_v7, 1 }
 0x311   :  { %v1149_v33 = vadd.f32 %v1148_v25, %v1125_v4  ;;  %v1126_v36 = vmul.f32 %v3183_v1, %v1070_v26  ;;  %1186 = vadd.xlane.f32.xlu0 %v1178_v29  ;;  %v1145_v37 = vadd.f32 %v1144_v22, %v1143_v3  ;;  %v3189_v22 = vunpack.i.h.bf16 %v3187_v47 }
 0x312   :  { %v919_v41 = vpop.f32.mrb[10].mxu0  ;;  %v1141_v42 = vadd.f32 %v1140_v32, %v1139_v7 }
 0x313   :  { %v1150_v43 = vrot.slane %v1149_v33, 2  ;;  %v1154_v44 = vrot.slane %v1126_v36, 4  ;;  %v1073_v45 = vadd.f32 %v4487_v23, %v919_v41  ;;  %v921_v46 = vpop.f32.mrb[11].mxu0  ;;  %v1146_v51 = vrot.slane %v1145_v37, 1 }
 0x314   :  { %v1179_v53 = vmul.f32 %v1141_v42, %v1062_v28 }
 0x315   :  { %v1155_v55 = vadd.f32 %v1154_v44, %v1126_v36  ;;  %v1127_v56 = vmul.f32 %v3184_v35, %v1073_v45  ;;  %v1147_v54 = vadd.f32 %v1146_v51, %v1145_v37  ;;  %v1151_v57 = vadd.f32 %v1150_v43, %v1149_v33 }
 0x316   :  { %1188 = vadd.xlane.f32.xlu1 %v1179_v53  ;;  %v925_v59 = vpop.f32.mrb[12].mxu0  ;;  %v1071_v37 = vadd.f32 %v4496_v50, %v915_v27 }
 0x317   :  { %v1156_v38 = vrot.slane %v1155_v55, 2  ;;  %v1160_v62 = vrot.slane %v1127_v56, 4  ;;  %v1076_v63 = vadd.f32 %v4487_v23, %v925_v59  ;;  %v927_v1 = vpop.f32.mrb[13].mxu0  ;;  %v1180_v3 = vmul.f32 %v1147_v54, %v1065_v52 }
 0x318   :  { %v1152_v4 = vrot.slane %v1151_v57, 1  ;;  %v1074_v52 = vadd.f32 %v4496_v50, %v921_v46  ;;  %v1077_v27 = vadd.f32 %v4496_v50, %v927_v1 }
 0x319   :  { %v1161_v5 = vadd.f32 %v1160_v62, %v1127_v56  ;;  %v1128_v7 = vmul.f32 %v3188_v58, %v1076_v63  ;;  %1190 = vadd.xlane.f32.xlu0 %v1180_v3  ;;  %v1157_v8 = vadd.f32 %v1156_v38, %v1155_v55 }
 0x31a   :  { %v931_v25 = vpop.f32.mrb[14].mxu0  ;;  %v1153_v26 = vadd.f32 %v1152_v4, %v1151_v57 }
 0x31b   :  { %v1162_v29 = vrot.slane %v1161_v5, 2  ;;  %v1166_v32 = vrot.slane %v1128_v7, 4  ;;  %v1079_v33 = vadd.f32 %v4487_v23, %v931_v25  ;;  %v933_v35 = vpop.f32.mrb[15].mxu0  ;;  %v1158_v36 = vrot.slane %v1157_v8, 1 }
 0x31c   :  { %v1181_v28 = vmul.f32 %v1153_v26, %v1068_v49  ;;  %v1080_v63 = vadd.f32 %v4496_v50, %v933_v35 }
 0x31d   :  { %v1167_v41 = vadd.f32 %v1166_v32, %v1128_v7  ;;  %v1129_v42 = vmul.f32 %v3189_v22, %v1079_v33  ;;  %v1159_v43 = vadd.f32 %v1158_v36, %v1157_v8  ;;  %v1163_v44 = vadd.f32 %v1162_v29, %v1161_v5 }
 0x31e   :  { %1192 = vadd.xlane.f32.xlu0 %v1181_v28  ;;  %v4513_v7 = vand.u32 127, %v398_v10 }
 0x31f   :  { %v1168_v45 = vrot.slane %v1167_v41, 2  ;;  %v1172_v51 = vrot.slane %v1129_v42, 4  ;;  %v1182_v61 = vmul.f32 %v1159_v43, %v1071_v37  ;;  %v1164_v47 = vrot.slane %v1163_v44, 1 }
 0x320   :  { %v1212_v49 = vsub.s32 %v4513_v7, %v4367_v24 }
 0x321   :  { %v1173_v53 = vadd.f32 %v1172_v51, %v1129_v42  ;;  %1194 = vadd.xlane.f32.xlu1 %v1182_v61  ;;  %v1165_v55 = vadd.f32 %v1164_v47, %v1163_v44  ;;  %v1169_v23 = vadd.f32 %v1168_v45, %v1167_v41 }
 0x323   :  { %v1174_v56 = vrot.slane %v1173_v53, 2  ;;  %v1183_v54 = vmul.f32 %v1165_v55, %v1074_v52  ;;  %v1170_v57 = vrot.slane %v1169_v23, 1  ;;  %v528_v55 = vld [vmem:[#allocation10 + $0x28] sm:$0xff] }
 0x325   :  { %1196 = vadd.xlane.f32.xlu0 %v1183_v54  ;;  %v1171_v58 = vadd.f32 %v1170_v57, %v1169_v23  ;;  %v1175_v59 = vadd.f32 %v1174_v56, %v1173_v53  ;;  %v525_v53 = vld [vmem:[#allocation10 + $0x10] sm:$0xff]  ;;  %v531_v23 = vld [vmem:[#allocation10 + $0x40] sm:$0xff]  ;;  %v534_v54 = vld [vmem:[#allocation10 + $0x58] sm:$0x7] }
 0x326   :  { %v3004_v56 = vpack.c.bf16 %v528_v55, %v525_v53  ;;  %v3008_v57 = vpack.c.bf16 %v534_v54, %v531_v23  ;;  %v1416_v23 = vrot.slane %v4459_v15, 4 }
 0x327   :  { %v1184_v38 = vmul.f32 %v1171_v58, %v1077_v27  ;;  %v1176_v62 = vrot.slane %v1175_v59, 1  ;;  %v516_v27 = vld [vmem:[#allocation8 + $0x10] sm:$0xff]  ;;  %v519_v58 = vld [vmem:[#allocation8 + $0x28] sm:$0xff] }
 0x328   :  { %3005 = vmatprep.subr.bf16.mxu1 %v3004_v56 }
 0x329   :  { %1198 = vadd.xlane.f32.xlu1 %v1184_v38  ;;  %v1177_v3 = vadd.f32 %v1176_v62, %v1175_v59  ;;  %3007 = vmatpush3.bf16.msra.mxu1 %v3004_v56  ;;  %v3018_v59 = vpack.c.bf16 %v519_v58, %v516_v27  ;;  %v522_v38 = vld [vmem:[#allocation8 + $0x40] sm:$0xf]  ;;  %v1396_v27 = vld [vmem:[#allocation13 + $0x20] sm:$0xff]  ;;  %v1397_v58 = vld [vmem:[#allocation13 + $0x28] sm:$0xff] }
 0x32a   :  { %3010 = vmatprep.subr.msk.bf16.mxu1 %vm4356_vm2, %v3008_v57 }
 0x32b   :  { %v1185_v4 = vmul.f32 %v1177_v3, %v1080_v63 }
 0x32d   :  { %1200 = vadd.xlane.f32.xlu0 %v1185_v4  ;;  %3013 = vmatpush3.bf16.msk.msra.mxu1 %vm4356_vm2, %v3008_v57  ;;  %v1302_v57 = vsub.s32 4, %v4367_v24 }
 0x32e   :  { %3019 = vmatprep.subr.bf16.mxu1 %v3018_v59 }
 0x330   :  { %2809 = vmatmul.mubr.msk.f32.vlgmr.msra.gmra.mrb[0].mxu1 %vm535_vm3, %v4377_v31 }
 0x331   :  { %2811 = vmatprep.mubr.msk.f32.mxu1 %vm535_vm3, %v4389_v39  ;;  %3021 = vmatpush3.bf16.msra.mxu1 %v3018_v59 }
 0x332   :  { %2824 = vmatprep.subr.msk.mxu1 %vm813_vm4, %v522_v38 }
 0x334   :  { %2812 = vmatmul.mubr.msk.f32.gmra.mrb[2].mxu1 %vm535_vm3, %v4399_v48 }
 0x335   :  { %2814 = vmatprep.mubr.msk.f32.mxu1 %vm535_vm3, %v4415_v60  ;;  %2825 = vmatpush3.msk.msra.mxu1 %vm813_vm4, %v522_v38  ;;  %v3032_v38 = vpack.c.bf16 %v1397_v58, %v1396_v27  ;;  %v1406_v58 = vld [vmem:[#allocation13 + $0x70] sm:$0xff] }
 0x338   :  { %2815 = vmatmul.mubr.msk.f32.gmra.mrb[4].mxu1 %vm535_vm3, %v4428_v6 }
 0x339   :  { %2817 = vmatprep.mubr.msk.f32.mxu1 %vm535_vm3, %v4434_v9 }
 0x33a   :  { %509 = vperm.xlu1 %3179, %v4374_v30  }
 0x33c   :  { %2818 = vmatmul.mubr.msk.f32.gmra.mrb[6].mxu1 %vm535_vm3, %v4439_v11 }
 0x33d   :  { %2826 = vmatprep.mubr.msk.f32.mxu1 %vm788_vm13, %v4444_v12 }
 0x340   :  { %2827 = vmatmul.mubr.msk.f32.vlgmr.msra.gmra.mrb[0].mxu1 %vm788_vm13, %v4449_v13 }
 0x341   :  { %2829 = vmatprep.mubr.msk.f32.mxu1 %vm788_vm13, %v4454_v14 }
 0x344   :  { %2830 = vmatmul.mubr.msk.f32.gmra.mrb[2].mxu1 %vm788_vm13, %v4459_v15 }
 0x345   :  { %2832 = vmatprep.mubr.msk.f32.mxu1 %vm788_vm13, %v4464_v16 }
 0x348   :  { %2833 = vmatmul.mubr.msk.f32.gmra.mrb[4].mxu1 %vm788_vm13, %v4469_v18 }
 0x349   :  { %2835 = vmatprep.mubr.msk.f32.mxu1 %vm788_vm13, %v4474_v19 }
 0x34c   :  { %2836 = vmatmul.mubr.msk.f32.gmra.mrb[6].mxu1 %vm788_vm13, %v4479_v20 }
 0x34d   :  { %2844 = vmatprep.mubr.msk.f32.mxu1 %vm3841_vm12, %v3836_v0 }
 0x39e   :  { %v1187_v46 = vpop.xlane.xlu0 %1186 }
 0x39f   :  { %v1213_v29 = vrot.slane %v1187_v46, %v1212_v49 }
 0x3a3   :  { %v1189_v8 = vpop.xlane.xlu1 %1188 }
 0x3a4   :  { %v1217_v25 = vrot.slane %v1189_v8, %v1212_v49 }
 0x3a6   :  { %v1191_v5 = vpop.xlane.xlu0 %1190  ;;  %v1243_v10 = vsel %vm1242_vm14, %v1217_v25, %v1213_v29 }
 0x3a7   :  { %v1221_v50 = vrot.slane %v1191_v5, %v1212_v49 }
 0x3a9   :  { %v1245_v36 = vsel %vm1244_vm15, %v1221_v50, %v1243_v10 }
 0x3ab   :  { %v1193_v1 = vpop.xlane.xlu0 %1192 }
 0x3ac   :  { %v1225_v32 = vrot.slane %v1193_v1, %v1212_v49 }
 0x3ae   :  { %v1195_v22 = vpop.xlane.xlu1 %1194  ;;  %v1247_v28 = vsel %vm1246_vm5, %v1225_v32, %v1245_v36 }
 0x3af   :  { %v1229_v30 = vrot.slane %v1195_v22, %v1212_v49 }
 0x3b1   :  { %v1249_v41 = vsel %vm1248_vm6, %v1229_v30, %v1247_v28  ;;  %v1309_v28 = vsub.s32 5, %v4367_v24 }
 0x3b2   :  { %v1197_v26 = vpop.xlane.xlu0 %1196 }
 0x3b3   :  { %v1233_v35 = vrot.slane %v1197_v26, %v1212_v49 }
 0x3b5   :  { %v1251_v44 = vsel %vm1250_vm7, %v1233_v35, %v1249_v41  ;;  %v1392_v41 = vld [vmem:[#allocation13] sm:$0xff] }
 0x3b6   :  { %v1199_v33 = vpop.xlane.xlu1 %1198 }
 0x3b7   :  { %v1237_v37 = vrot.slane %v1199_v33, %v1212_v49 }
 0x3b9   :  { %v1253_v51 = vsel %vm1252_vm8, %v1237_v37, %v1251_v44  ;;  %v1053_v37 = vsub.s32 2, %v4367_v24  ;;  %v1412_v44 = vrot.slane %v4449_v13, 6  ;;  %v1414_v13 = vrot.slane %v4454_v14, 5 }
 0x3ba   :  { %v510_v42 = vpop.permute.xlu1 %509  ;;  %v1201_v43 = vpop.xlane.xlu0 %1200 }
 0x3bb   :  { %v1241_v45 = vrot.slane %v1201_v43, %v1212_v49  ;;  %vm511_vm11 = vcmp.lt.s32.totalorder %v4513_v7, %v510_v42  ;;  %v1393_v42 = vld [vmem:[#allocation13 + $0x8] sm:$0xff]  ;;  %v1411_v43 = vrot.slane %v4444_v12, 7  ;;  %v1394_v12 = vld [vmem:[#allocation13 + $0x10] sm:$0xff] }
 0x3bc   :  { %v2640_v46 = vsel %vm511_vm11, 1.0, %v3836_v0 }
 0x3bd   :  { %v1255_v61 = vsel %vm1254_vm9, %v1241_v45, %v1253_v51  ;;  %v3026_v45 = vpack.c.bf16 %v1393_v42, %v1392_v41  ;;  %v3840_v51 = vmov 0.0|0.0   ;;  %v1413_v55 = vsel %vm1242_vm14, %v1412_v44, %v1411_v43  ;;  %v1401_v41 = vld [vmem:[#allocation13 + $0x48] sm:$0xff] }
 0x3be   :  { %v1257_v47 = vsel %vm511_vm11, %v1255_v61, -1e+30  ;;  %3025 = vmatprep.subr.bf16.mxu0 %v3840_v51  ;;  %3022 = vmatprep.subr.bf16.mxu1 %v3840_v51  ;;  %v1295_v61 = vsub.s32 3, %v4367_v24  ;;  %v1415_v59 = vsel %vm1244_vm15, %v1414_v13, %v1413_v55  ;;  %v1422_v42 = vrot.slane %v4474_v19, 1  ;;  %v1405_v13 = vld [vmem:[#allocation13 + $0x68] sm:$0xff] }
 0x3bf   :  { %v1259_v52 = vsel %vm1258_vm10, %v1257_v47, -inf  ;;  %3027 = vmatpush3.bf16.msra.mxu0 %v3026_v45  ;;  %v1593_v45 = vrot.slane %v4389_v39, 5  ;;  %v1586_v39 = vld [vmem:[#allocation16] sm:$0xff]  ;;  %v1595_v55 = vrot.slane %v4399_v48, 4  ;;  %v1589_v48 = vld [vmem:[#allocation16 + $0x18] sm:$0x7] }
 0x3c0   :  { %1260 = vmax.xlane.f32.xlu0 %v1259_v52  ;;  %v1395_v52 = vld [vmem:[#allocation13 + $0x18] sm:$0xff]  ;;  %3028 = vmatprep.subr.bf16.mxu0 %v3840_v51  ;;  %vm1697_vm11 = vcmask 15360  }
 0x3c1   :  { %v3029_v53 = vpack.c.bf16 %v1395_v52, %v1394_v12 }
 0x3c3   :  { %3030 = vmatpush3.bf16.msra.mxu0 %v3029_v53  ;;  %v1587_v53 = vld [vmem:[#allocation16 + $0x8] sm:$0xff] }
 0x3c4   :  { %3031 = vmatprep.subr.bf16.mxu0 %v3840_v51  ;;  %v3050_v27 = vpack.c.bf16 %v1587_v53, %v1586_v39 }
 0x3c7   :  { %3033 = vmatpush3.bf16.msra.mxu0 %v3032_v38  ;;  %v1407_v38 = vld [vmem:[#allocation13 + $0x78] sm:$0xff] }
 0x3c8   :  { %3034 = vmatprep.subr.bf16.mxu0 %v3840_v51 }
 0x413   :  { %v4568_v1 = vpop.f32.mrb[0].mxu1 }
 0x414   :  { %v4570_v49 = vpop.f32.mrb[1].mxu1 }
 0x417   :  { %v4572_v22 = vpop.f32.mrb[2].mxu1 }
 0x418   :  { %v4574_v25 = vpop.f32.mrb[3].mxu1 }
 0x41b   :  { %v4576_v50 = vpop.f32.mrb[4].mxu1 }
 0x41c   :  { %v4578_v26 = vpop.f32.mrb[5].mxu1 }
 0x41f   :  { %v4580_v29 = vpop.f32.mrb[6].mxu1 }
 0x420   :  { %v4582_v7 = vpop.f32.mrb[7].mxu1 }
 0x44d   :  { %v1261_v62 = vpop.xlane.xlu0 %1260 }
 0x44e   :  { %v1262_v63 = vsub.f32 %v1257_v47, %v1261_v62  ;;  %v1323_v47 = vsub.s32 7, %v4367_v24  ;;  %v1418_v62 = vrot.slane %v4464_v16, 3 }
 0x450   :  { %v1263_v3 = vmul.f32 1.442695, %v1262_v63  ;;  %v1417_v63 = vsel %vm1246_vm5, %v1416_v23, %v1415_v59  ;;  %v1597_v59 = vrot.slane %v4415_v60, 3 }
 0x452   :  { %3191 = vpow2.f32 %v1263_v3 }
 0x45c   :  { %v3192_v4 = vpop.eup %3191 }
 0x45d   :  { %v1265_v5 = vmul.f32 %v3192_v4, %v2640_v46  ;;  %v1316_v4 = vsub.s32 6, %v4367_v24  ;;  %v1398_v46 = vld [vmem:[#allocation13 + $0x30] sm:$0xff] }
 0x45f   :  { %v1266_v8 = vsel %vm1258_vm10, %v1265_v5, 0.0  ;;  %vm1701_vm10 = vcmask 1041408  }
 0x460   :  { %1267 = vadd.xlane.f32.xlu0 %v1266_v8 }
 0x4ed   :  { %v1268_v32 = vpop.xlane.xlu0 %1267 }
 0x4ee   :  { %v1269_v30 = vmax.f32 %v1268_v32, 1e-30  ;;  %v1420_v32 = vrot.slane %v4469_v18, 2 }
 0x4f0   :  { %3193 = vrcp.f32 %v1269_v30  ;;  %v1419_v30 = vsel %vm1248_vm6, %v1418_v62, %v1417_v63  ;;  %v1588_v62 = vld [vmem:[#allocation16 + $0x10] sm:$0xff] }
 0x4f1   :  { %v1421_v44 = vsel %vm1250_vm7, %v1420_v32, %v1419_v30 }
 0x4f2   :  { %v1423_v12 = vsel %vm1252_vm8, %v1422_v42, %v1421_v44 }
 0x4fa   :  { %v3194_v33 = vpop.eup %3193 }
 0x4fb   :  { %v1271_v10 = vmul.f32 %v3194_v33, %v1265_v5  ;;  %v1399_v5 = vld [vmem:[#allocation13 + $0x38] sm:$0xff]  ;;  %v1590_v33 = vrot.slane %v4360_v17, 7 }
 0x4fc   :  { %v3035_v8 = vpack.c.bf16 %v1399_v5, %v1398_v46  ;;  %v1601_v46 = vrot.slane %v4434_v9, 1 }
 0x4fd   :  { %v1282_v35 = vrot.slane %v1271_v10, %v1049_v40  ;;  %v1275_v36 = vrot.slane %v1271_v10, %v4382_v34  ;;  %v1289_v34 = vrot.slane %v1271_v10, %v1053_v37  ;;  %v1310_v40 = vrot.slane %v1271_v10, %v1309_v28  ;;  %v1400_v28 = vld [vmem:[#allocation13 + $0x40] sm:$0xff] }
 0x4fe   :  { %v1296_v56 = vrot.slane %v1271_v10, %v1295_v61  ;;  %v1324_v54 = vrot.slane %v1271_v10, %v1323_v47  ;;  %v1303_v3 = vrot.slane %v1271_v10, %v1302_v57  ;;  %3036 = vmatpush3.bf16.msra.mxu0 %v3035_v8  ;;  %v3038_v43 = vpack.c.bf16 %v1401_v41, %v1400_v28  ;;  %v1404_v47 = vld [vmem:[#allocation13 + $0x60] sm:$0xff] }
 0x4ff   :  { %1284 = vbcast.lane.b32.xlu1 %v1282_v35, 256  ;;  %1277 = vbcast.lane.b32.xlu0 %v1275_v36, 256  ;;  %v1591_v35 = vrot.slane %v4377_v31, 6  ;;  %v1317_v36 = vrot.slane %v1271_v10, %v1316_v4  ;;  %v1402_v31 = vld [vmem:[#allocation13 + $0x50] sm:$0xff]  ;;  %v1403_v10 = vld [vmem:[#allocation13 + $0x58] sm:$0xff]  ;;  %v3044_v57 = vpack.c.bf16 %v1405_v13, %v1404_v47  ;;  %v3053_v4 = vpack.c.bf16 %v1589_v48, %v1588_v62 }
 0x500   :  { %3037 = vmatprep.subr.bf16.mxu0 %v3840_v51  ;;  %v3041_v52 = vpack.c.bf16 %v1403_v10, %v1402_v31  ;;  %v1054_v8 = vrot.slane %v4483_v21, %v1053_v37 }
 0x501   :  { %v1592_v17 = vsel %vm1242_vm14, %v1591_v35, %v1590_v33 }
 0x502   :  { %3039 = vmatpush3.bf16.msra.mxu0 %v3038_v43  ;;  %v1594_v23 = vsel %vm1244_vm15, %v1593_v45, %v1592_v17  ;;  %v1063_v32 = vadd.f32 %v4568_v1, %v1054_v8  ;;  %v1060_v30 = vadd.f32 %v1054_v8, %v4570_v49  ;;  %v1066_v41 = vadd.f32 %v1054_v8, %v4574_v25 }
 0x503   :  { %1291 = vbcast.lane.b32.xlu1 %v1289_v34, 256  ;;  %1312 = vbcast.lane.b32.xlu0 %v1310_v40, 256  ;;  %v1408_v34 = vld [vmem:[#allocation14] sm:$0xff]  ;;  %v1409_v40 = vld [vmem:[#allocation14 + $0x8] sm:$0xff]  ;;  %v1596_v63 = vsel %vm1246_vm5, %v1595_v55, %v1594_v23  ;;  %v1081_v31 = vadd.f32 %v4580_v29, %v1054_v8  ;;  %v1072_v55 = vadd.f32 %v1054_v8, %v4578_v26 }
 0x504   :  { %v3023_v61 = vpack.c.bf16 %v1409_v40, %v1408_v34  ;;  %3040 = vmatprep.subr.bf16.mxu0 %v3840_v51  ;;  %v1598_v60 = vsel %vm1248_vm6, %v1597_v59, %v1596_v63 }
 0x506   :  { %3024 = vmatpush3.bf16.msra.mxu1 %v3023_v61  ;;  %3042 = vmatpush3.bf16.msra.mxu0 %v3041_v52  ;;  %v1069_v61 = vadd.f32 %v4572_v22, %v1054_v8 }
 0x507   :  { %1298 = vbcast.lane.b32.xlu1 %v1296_v56, 256  ;;  %1326 = vbcast.lane.b32.xlu0 %v1324_v54, 256  ;;  %v1410_v56 = vld [vmem:[#allocation14 + $0x10] sm:$0xf]  ;;  %v1424_v54 = vsel %vm1254_vm9, %v4479_v20, %v1423_v12  ;;  %v1599_v20 = vrot.slane %v4428_v6, 2 }
 0x508   :  { %2842 = vmatprep.subr.mxu1 %v3836_v0  ;;  %3043 = vmatprep.subr.bf16.mxu0 %v3840_v51 }
 0x509   :  { %v1600_v6 = vsel %vm1250_vm7, %v1599_v20, %v1598_v60 }
 0x50a   :  { %2843 = vmatpush3.msk.msra.mxu1 %vm813_vm4, %v1410_v56  ;;  %3045 = vmatpush3.bf16.msra.mxu0 %v3044_v57  ;;  %v1602_v5 = vsel %vm1252_vm8, %v1601_v46, %v1600_v6 }
 0x50b   :  { %1305 = vbcast.lane.b32.xlu1 %v1303_v3, 256  ;;  %3049 = vmatprep.subr.bf16.mxu1 %v3840_v51  ;;  %v3047_v3 = vpack.c.bf16 %v1407_v38, %v1406_v58  ;;  %v1603_v9 = vsel %vm1254_vm9, %v4439_v11, %v1602_v5  ;;  %v1075_v11 = vadd.f32 %v4576_v50, %v1054_v8 }
 0x50c   :  { %2845 = vmatmul.mubr.msk.f32.vlgmr.msra.gmra.mrb[8].mxu1 %vm788_vm13, %v1424_v54  ;;  %3046 = vmatprep.subr.bf16.mxu0 %v3840_v51  ;;  %v1078_v38 = vadd.f32 %v1054_v8, %v4582_v7 }
 0x50d   :  { %3051 = vmatpush3.bf16.msra.mxu1 %v3050_v27  ;;  %2890 = vmatprep.mubr.msk.f32.mxu1 %vm3841_vm12, %v3836_v0 }
 0x50e   :  { %3052 = vmatprep.subr.bf16.mxu1 %v3840_v51  ;;  %3048 = vmatpush3.bf16.msra.mxu0 %v3047_v3 }
 0x50f   :  { %1319 = vbcast.lane.b32.xlu1 %v1317_v36, 256  ;;  %3083 = vmatprep.subr.bf16.mxu0 %v3840_v51 }
 0x511   :  { %3055 = vmatpush3.bf16.msk.msra.mxu1 %vm4356_vm2, %v3053_v4 }
 0x512   :  { %2893 = vmatprep.subr.mxu1 %v3836_v0 }
 0x514   :  { %2891 = vmatmul.mubr.msk.f32.vlgmr.msra.gmra.mrb[10].mxu1 %vm535_vm3, %v1603_v9 }
 0x515   :  { %2895 = vmatprep.mubr.msk.f32.mxu1 %vm3841_vm12, %v3836_v0 }
 0x571   :  { %v1285_v33 = vpop.permute.xlu1 %1284  ;;  %v1278_v35 = vpop.permute.xlu0 %1277 }
 0x572   :  { %v1329_v36 = vmul.f32 %v1285_v33, %v1063_v32  ;;  %v1328_v28 = vmul.f32 %v1278_v35, %v1060_v30 }
 0x574   :  { %v1342_v42 = vrot.slane %v1329_v36, 4  ;;  %v1336_v43 = vrot.slane %v1328_v28, 4 }
 0x575   :  { %v1292_v44 = vpop.permute.xlu1 %1291  ;;  %v1313_v45 = vpop.permute.xlu0 %1312 }
 0x576   :  { %v1343_v34 = vadd.f32 %v1342_v42, %v1329_v36  ;;  %v1337_v24 = vadd.f32 %v1336_v43, %v1328_v28  ;;  %v1330_v40 = vmul.f32 %v1292_v44, %v1066_v41  ;;  %v1333_v21 = vmul.f32 %v1313_v45, %v1075_v11 }
 0x578   :  { %v1344_v37 = vrot.slane %v1343_v34, 2  ;;  %v1338_v1 = vrot.slane %v1337_v24, 2  ;;  %v1348_v17 = vrot.slane %v1330_v40, 4  ;;  %v1366_v49 = vrot.slane %v1333_v21, 4 }
 0x579   :  { %v1299_v10 = vpop.permute.xlu1 %1298  ;;  %v1327_v25 = vpop.permute.xlu0 %1326 }
 0x57a   :  { %v1345_v47 = vadd.f32 %v1344_v37, %v1343_v34  ;;  %v1349_v50 = vadd.f32 %v1348_v17, %v1330_v40  ;;  %v1367_v12 = vadd.f32 %v1366_v49, %v1333_v21  ;;  %v1331_v52 = vmul.f32 %v1299_v10, %v1069_v61 }
 0x57b   :  { %v1335_v13 = vmul.f32 %v1327_v25, %v1081_v31  ;;  %v1339_v39 = vadd.f32 %v1338_v1, %v1337_v24 }
 0x57c   :  { %v1350_v53 = vrot.slane %v1349_v50, 2  ;;  %v1354_v23 = vrot.slane %v1331_v52, 4  ;;  %v1346_v57 = vrot.slane %v1345_v47, 1  ;;  %v1368_v58 = vrot.slane %v1367_v12, 2 }
 0x57d   :  { %v1378_v56 = vrot.slane %v1335_v13, 4  ;;  %v1306_v54 = vpop.permute.xlu1 %1305  ;;  %v1340_v62 = vrot.slane %v1339_v39, 1 }
 0x57e   :  { %v1351_v27 = vadd.f32 %v1350_v53, %v1349_v50  ;;  %v1355_v22 = vadd.f32 %v1354_v23, %v1331_v52  ;;  %v1332_v29 = vmul.f32 %v1306_v54, %v1072_v55  ;;  %v1347_v46 = vadd.f32 %v1346_v57, %v1345_v47  ;;  %v1689_v57 = vld [vmem:[#allocation19] sm:$0x3] }
 0x57f   :  { %v1379_v59 = vadd.f32 %v1378_v56, %v1335_v13  ;;  %v1369_v26 = vadd.f32 %v1368_v58, %v1367_v12  ;;  %v1341_v9 = vadd.f32 %v1340_v62, %v1339_v39  ;;  %2894 = vmatpush3.msk.msra.mxu1 %vm1701_vm10, %v1689_v57 }
 0x580   :  { %v1352_v48 = vrot.slane %v1351_v27, 1  ;;  %v1356_v63 = vrot.slane %v1355_v22, 2  ;;  %v1360_v3 = vrot.slane %v1332_v29, 4  ;;  %3195 = vtanh.f32 %v1347_v46  ;;  %2898 = vmatprep.subr.mxu1 %v3836_v0 }
 0x581   :  { %v1380_v20 = vrot.slane %v1379_v59, 2  ;;  %v1320_v4 = vpop.permute.xlu1 %1319  ;;  %v1370_v7 = vrot.slane %v1369_v26, 1  ;;  %3197 = vtanh.f32 %v1341_v9 }
 0x582   :  { %v1334_v60 = vmul.f32 %v1320_v4, %v1078_v38  ;;  %v1357_v6 = vadd.f32 %v1356_v63, %v1355_v22  ;;  %v1361_v5 = vadd.f32 %v1360_v3, %v1332_v29  ;;  %v1353_v30 = vadd.f32 %v1352_v48, %v1351_v27  ;;  %v1781_v48 = vld [vmem:[#allocation22] sm:$0x7] }
 0x583   :  { %v1381_v35 = vadd.f32 %v1380_v20, %v1379_v59  ;;  %v1371_v45 = vadd.f32 %v1370_v7, %v1369_v26  ;;  %v2683_v59 = vld [vmem:[#allocation17] ss:$0 sm:$0xff]  ;;  %v3842_v63 = vmov 3   ;;  %v2684_v20 = vld [vmem:[#allocation20] ss:$0 sm:$0xff] }
 0x584   :  { %v1372_v32 = vrot.slane %v1334_v60, 4  ;;  %v1358_v33 = vrot.slane %v1357_v6, 1  ;;  %v1362_v36 = vrot.slane %v1361_v5, 2  ;;  %3199 = vtanh.f32 %v1353_v30  ;;  %3190 = vset.pattern.permute.xlu0 %v3842_v63  ;;  %v2027_v30 = vld [vmem:[#allocation26] sm:$0xff] }
 0x585   :  { %v1382_v42 = vrot.slane %v1381_v35, 1 }
 0x586   :  { %v1373_v28 = vadd.f32 %v1372_v32, %v1334_v60  ;;  %v1359_v8 = vadd.f32 %v1358_v33, %v1357_v6  ;;  %v1363_v41 = vadd.f32 %v1362_v36, %v1361_v5  ;;  %v1909_v32 = vld [vmem:[#allocation23] sm:$0x3]  ;;  %v2028_v33 = vld [vmem:[#allocation26 + $0x8] sm:$0xff] }
 0x587   :  { %v1383_v40 = vadd.f32 %v1382_v42, %v1381_v35  ;;  %v3057_v35 = vpack.c.bf16 %v2028_v33, %v2027_v30  ;;  %v2021_v30 = vld [vmem:[#allocation25 + $0x50] sm:$0xff]  ;;  %v2022_v33 = vld [vmem:[#allocation25 + $0x58] sm:$0xff] }
 0x588   :  { %v1374_v11 = vrot.slane %v1373_v28, 2  ;;  %v1364_v43 = vrot.slane %v1363_v41, 1  ;;  %3201 = vtanh.f32 %v1359_v8 }
 0x58a   :  { %v1375_v44 = vadd.f32 %v1374_v11, %v1373_v28  ;;  %v1365_v34 = vadd.f32 %v1364_v43, %v1363_v41  ;;  %v4663_v37 = vpop.eup %3195  ;;  %v2029_v28 = vld [vmem:[#allocation26 + $0x10] sm:$0xf] }
 0x58b   :  { %v4665_v1 = vpop.eup %3197 }
 0x58c   :  { %v1376_v24 = vrot.slane %v1375_v44, 1  ;;  %3203 = vtanh.f32 %v1365_v34  ;;  %v1508_v61 = vsel %vm1242_vm14, %v4663_v37, %v4665_v1  ;;  %v3219_v34 = vld [vmem:[#allocation2] sm:$0xff] }
 0x58d   :  { %3205 = vtanh.f32 %v1371_v45 }
 0x58e   :  { %v1377_v21 = vadd.f32 %v1376_v24, %v1375_v44  ;;  %v4667_v17 = vpop.eup %3199 }
 0x58f   :  { %v1509_v31 = vsel %vm1244_vm15, %v4667_v17, %v1508_v61 }
 0x590   :  { %3207 = vtanh.f32 %v1377_v21 }
 0x591   :  { %3209 = vtanh.f32 %v1383_v40  ;;  %v3220_v40 = vld [vmem:[#allocation2 + $0x8] sm:$0xff] }
 0x592   :  { %v4669_v49 = vpop.eup %3201 }
 0x593   :  { %v1510_v25 = vsel %vm1246_vm5, %v4669_v49, %v1509_v31 }
 0x596   :  { %v4676_v10 = vpop.eup %3203 }
 0x597   :  { %v1511_v47 = vsel %vm1248_vm6, %v4676_v10, %v1510_v25  ;;  %v4682_v50 = vpop.eup %3205 }
 0x598   :  { %v1512_v52 = vsel %vm1250_vm7, %v4682_v50, %v1511_v47 }
 0x59a   :  { %v4684_v12 = vpop.eup %3207 }
 0x59b   :  { %v4688_v13 = vpop.eup %3209  ;;  %v1513_v39 = vsel %vm1252_vm8, %v4684_v12, %v1512_v52 }
 0x59c   :  { %v1514_v53 = vsel %vm1254_vm9, %v4688_v13, %v1513_v39 }
 0x59d   :  { %2880 = vmatmul.mubr.f32.vlgmr.msra.gmra.mrb[16].mxu0 %v1514_v53 }
 0x59e   :  { %2960 = vmatprep.mubr.msk.f32.mxu0 %vm3841_vm12, %v3836_v0 }
 0x5df   :  { %v1496_v55 = vpop.f32.mrb[8].mxu1 }
 0x5e0   :  { %v2846_v23 = vpop.f32.mrb[9].mxu1 }
 0x5e7   :  { %v1675_v56 = vpop.f32.mrb[10].mxu1 }
 0x5e8   :  { %v2892_v54 = vpop.f32.mrb[11].mxu1 }
 0x670   :  { %v1582_v27 = vpop.f32.mrb[16].mxu0 }
 0x671   :  { %v1583_v58 = vadd.f32 %v1582_v27, %v1496_v55  ;;  %v2881_v22 = vpop.f32.mrb[17].mxu0  ;;  %v2011_v27 = vld [vmem:[#allocation25] sm:$0xff] }
 0x673   :  { %v1679_v29 = vadd.f32 %v1675_v56, %v1583_v58  ;;  %v2012_v58 = vld [vmem:[#allocation25 + $0x8] sm:$0xff] }
 0x675   :  { %v1687_v38 = vadd.f32 %v2683_v59, %v1679_v29  ;;  %v3221_v59 = vld [vmem:[#allocation2 + $0x38] sm:$0xff] }
 0x677   :  { %v1688_v62 = vmax.f32 %v1687_v38, 0.0  ;;  %v3060_v38 = vpack.c.bf16 %v2012_v58, %v2011_v27 }
 0x679   :  { %2896 = vmatmul.mubr.msk.f32.vlgmr.msra.gmra.mrb[12].mxu1 %vm1697_vm11, %v1688_v62  ;;  %v2013_v62 = vld [vmem:[#allocation25 + $0x10] sm:$0xff] }
 0x67a   :  { %2900 = vmatprep.mubr.msk.f32.mxu1 %vm3841_vm12, %v3836_v0  ;;  %2899 = vmatpush3.msk.msra.mxu1 %vm560_vm0, %v1781_v48  ;;  %v2014_v48 = vld [vmem:[#allocation25 + $0x18] sm:$0xff]  ;;  %vm2348_vm0 = vcmask 1046528  }
 0x67b   :  { %2903 = vmatprep.subr.mxu1 %v3836_v0 }
 0x74c   :  { %v1771_v3 = vpop.f32.mrb[12].mxu1 }
 0x74d   :  { %v1772_v4 = vadd.f32 %v2684_v20, %v1771_v3  ;;  %v2897_v60 = vpop.f32.mrb[13].mxu1  ;;  %v3063_v20 = vpack.c.bf16 %v2014_v48, %v2013_v62  ;;  %v2015_v3 = vld [vmem:[#allocation25 + $0x20] sm:$0xff] }
 0x74f   :  { %v1775_v46 = vsub.f32 0.0, %v1772_v4  ;;  %v2016_v4 = vld [vmem:[#allocation25 + $0x28] sm:$0xff] }
 0x750   :  { %v3066_v60 = vpack.c.bf16 %v2016_v4, %v2015_v3 }
 0x751   :  { %v1776_v26 = vmul.f32 1.442695, %v1775_v46  ;;  %v2017_v46 = vld [vmem:[#allocation25 + $0x30] sm:$0xff] }
 0x753   :  { %3211 = vpow2.f32 %v1776_v26  ;;  %v2018_v26 = vld [vmem:[#allocation25 + $0x38] sm:$0xff] }
 0x75d   :  { %v3212_v6 = vpop.eup %3211 }
 0x75e   :  { %v1778_v5 = vadd.f32 1.0, %v3212_v6  ;;  %v3069_v6 = vpack.c.bf16 %v2018_v26, %v2017_v46  ;;  %v3222_v46 = vld [vmem:[#allocation5] sm:$0xff] }
 0x760   :  { %3213 = vrcp.f32 %v1778_v5  ;;  %v2019_v5 = vld [vmem:[#allocation25 + $0x40] sm:$0xff] }
 0x76a   :  { %v3214_v9 = vpop.eup %3213 }
 0x76b   :  { %1884 = vperm.xlu0 %3190, %v3214_v9   ;;  %1910 = vrot.lane.b32.xlu1 %v3214_v9, %s3843_s5 }
 0x76c   :  { %2901 = vmatmul.mubr.msk.f32.vlgmr.msra.gmra.mrb[14].mxu1 %vm1782_vm1, %v3214_v9  ;;  %v2020_v9 = vld [vmem:[#allocation25 + $0x48] sm:$0xff]  ;;  %vm4862_vm1 = vmmov 1  }
 0x76d   :  { %2904 = vmatpush3.msk.msra.mxu1 %vm1701_vm10, %v1909_v32  ;;  %2905 = vmatprep.mubr.msk.f32.mxu1 %vm3841_vm12, %v3836_v0  ;;  %v3072_v32 = vpack.c.bf16 %v2020_v9, %v2019_v5  ;;  %v3224_v9 = vld [vmem:[#allocation5 + $0x10] sm:$0xff] }
 0x76e   :  { %3056 = vmatprep.subr.bf16.mxu1 %v3840_v51 }
 0x7dd   :  { %v1911_v36 = vpop.permute.xlu1 %1910 }
 0x7de   :  { %2906 = vmatmul.mubr.msk.f32.vlgmr.msra.gmra.mrb[16].mxu1 %vm1697_vm11, %v1911_v36  ;;  %v2023_v36 = vld [vmem:[#allocation25 + $0x60] sm:$0xff] }
 0x7df   :  { %3058 = vmatpush3.bf16.msra.mxu1 %v3057_v35  ;;  %2914 = vmatprep.mubr.msk.f32.mxu1 %vm3841_vm12, %v3836_v0  ;;  %v3075_v35 = vpack.c.bf16 %v2022_v33, %v2021_v30  ;;  %v3225_v30 = vld [vmem:[#allocation5 + $0x18] sm:$0xff] }
 0x7e0   :  { %2912 = vmatprep.subr.mxu1 %v3836_v0 }
 0x7e3   :  { %2913 = vmatpush3.msk.msra.mxu1 %vm813_vm4, %v2029_v28  ;;  %v2024_v28 = vld [vmem:[#allocation25 + $0x68] sm:$0xff]  ;;  %vm2344_vm4 = vcmask 384000  }
 0x7e4   :  { %3059 = vmatprep.subr.bf16.mxu1 %v3840_v51 }
 0x7ea   :  { %v1885_v7 = vpop.permute.xlu0 %1884 }
 0x7eb   :  { %v1886_v8 = vrot.slane %v1885_v7, 1  ;;  %v1887_v41 = vrot.slane %v1885_v7, 2  ;;  %v1888_v11 = vrot.slane %v1885_v7, 3  ;;  %v1889_v42 = vrot.slane %v1885_v7, 4 }
 0x7ec   :  { %v1890_v43 = vrot.slane %v1885_v7, 5  ;;  %v1891_v44 = vrot.slane %v1885_v7, 6  ;;  %v1892_v45 = vrot.slane %v1885_v7, 7  ;;  %v1908_v29 = vmul.f32 %v3221_v59, %v1885_v7 }
 0x7ed   :  { %v1901_v24 = vmul.f32 %v3219_v34, %v1886_v8  ;;  %v1902_v21 = vmul.f32 %v3220_v40, %v1887_v41  ;;  %v1903_v61 = vmul.f32 %v1888_v11, %v4454_v14  ;;  %v1904_v31 = vmul.f32 %v1889_v42, %v4459_v15  ;;  %v2025_v8 = vld [vmem:[#allocation25 + $0x70] sm:$0xff]  ;;  %v2026_v41 = vld [vmem:[#allocation25 + $0x78] sm:$0xff] }
 0x7ee   :  { %v1905_v25 = vmul.f32 %v1890_v43, %v4464_v16  ;;  %v1906_v53 = vmul.f32 %v1891_v44, %v4469_v18  ;;  %v1907_v55 = vmul.f32 %v1892_v45, %v4474_v19  ;;  %v3078_v7 = vpack.c.bf16 %v2024_v28, %v2023_v36  ;;  %v2220_v42 = vld [vmem:[#allocation28] sm:$0xff]  ;;  %v2221_v43 = vld [vmem:[#allocation28 + $0x8] sm:$0xff]  ;;  %v2222_v44 = vld [vmem:[#allocation28 + $0x10] sm:$0xff] }
 0x7ef   :  { %v2038_v47 = vrot.slane %v1901_v24, 7  ;;  %v2039_v52 = vrot.slane %v1902_v21, 6  ;;  %v2041_v39 = vrot.slane %v1903_v61, 5  ;;  %v2043_v23 = vrot.slane %v1904_v31, 4  ;;  %v2223_v34 = vld [vmem:[#allocation28 + $0x18] sm:$0x7] }
 0x7f0   :  { %v2045_v57 = vrot.slane %v1905_v25, 3  ;;  %v2047_v15 = vrot.slane %v1906_v53, 2  ;;  %v2049_v22 = vrot.slane %v1907_v55, 1  ;;  %v3081_v11 = vpack.c.bf16 %v2026_v41, %v2025_v8  ;;  %v3227_v8 = vld [vmem:[#allocation5 + $0x28] sm:$0xff] }
 0x7f1   :  { %v2040_v56 = vsel %vm1242_vm14, %v2039_v52, %v2038_v47  ;;  %v3084_v45 = vpack.c.bf16 %v2221_v43, %v2220_v42  ;;  %v3087_v24 = vpack.c.bf16 %v2223_v34, %v2222_v44  ;;  %v3228_v42 = vld [vmem:[#allocation5 + $0x30] sm:$0xff] }
 0x7f2   :  { %v2042_v54 = vsel %vm1244_vm15, %v2041_v39, %v2040_v56 }
 0x7f3   :  { %v2044_v14 = vsel %vm1246_vm5, %v2043_v23, %v2042_v54  ;;  %3085 = vmatpush3.bf16.msra.mxu0 %v3084_v45 }
 0x7f4   :  { %v2046_v16 = vsel %vm1248_vm6, %v2045_v57, %v2044_v14  ;;  %3086 = vmatprep.subr.bf16.mxu0 %v3840_v51 }
 0x7f5   :  { %v2048_v18 = vsel %vm1250_vm7, %v2047_v15, %v2046_v16 }
 0x7f6   :  { %v2050_v19 = vsel %vm1252_vm8, %v2049_v22, %v2048_v18 }
 0x7f7   :  { %v2051_v63 = vsel %vm1254_vm9, %v1908_v29, %v2050_v19  ;;  %3089 = vmatpush3.bf16.msk.msra.mxu0 %vm4356_vm2, %v3087_v24 }
 0x7f8   :  { %2915 = vmatmul.mubr.msk.f32.vlgmr.msra.gmra.mrb[18].mxu1 %vm788_vm13, %v2051_v63  ;;  %3090 = vmatprep.subr.bf16.mxu0 %v3840_v51  ;;  %vm2433_vm13 = vcmask 187392  }
 0x7f9   :  { %3061 = vmatpush3.bf16.msra.mxu1 %v3060_v38  ;;  %2949 = vmatprep.mubr.msk.f32.mxu1 %vm3841_vm12, %v3836_v0 }
 0x7fa   :  { %3062 = vmatprep.subr.bf16.mxu1 %v3840_v51 }
 0x7fd   :  { %3064 = vmatpush3.bf16.msra.mxu1 %v3063_v20 }
 0x7fe   :  { %3065 = vmatprep.subr.bf16.mxu1 %v3840_v51 }
 0x801   :  { %3067 = vmatpush3.bf16.msra.mxu1 %v3066_v60 }
 0x802   :  { %3068 = vmatprep.subr.bf16.mxu1 %v3840_v51 }
 0x805   :  { %3070 = vmatpush3.bf16.msra.mxu1 %v3069_v6  ;;  %v3223_v6 = vld [vmem:[#allocation5 + $0x8] sm:$0xff] }
 0x806   :  { %3071 = vmatprep.subr.bf16.mxu1 %v3840_v51 }
 0x809   :  { %3073 = vmatpush3.bf16.msra.mxu1 %v3072_v32 }
 0x80a   :  { %3074 = vmatprep.subr.bf16.mxu1 %v3840_v51 }
 0x80d   :  { %3076 = vmatpush3.bf16.msra.mxu1 %v3075_v35  ;;  %v3226_v35 = vld [vmem:[#allocation5 + $0x20] sm:$0xff] }
 0x80e   :  { %3077 = vmatprep.subr.bf16.mxu1 %v3840_v51 }
 0x811   :  { %3079 = vmatpush3.bf16.msra.mxu1 %v3078_v7 }
 0x812   :  { %3080 = vmatprep.subr.bf16.mxu1 %v3840_v51 }
 0x815   :  { %3082 = vmatpush3.bf16.msra.mxu1 %v3081_v11 }
 0x83f   :  { %v1855_v40 = vpop.f32.mrb[14].mxu1 }
 0x840   :  { %v1860_v21 = vrot.slane %v1855_v40, 1  ;;  %v1861_v61 = vrot.slane %v1855_v40, 2  ;;  %v2902_v31 = vpop.f32.mrb[15].mxu1  ;;  %v1862_v25 = vrot.slane %v1855_v40, 3  ;;  %v1863_v47 = vrot.slane %v1855_v40, 4 }
 0x841   :  { %v1864_v52 = vrot.slane %v1855_v40, 5  ;;  %v1865_v39 = vrot.slane %v1855_v40, 6  ;;  %v1866_v55 = vrot.slane %v1855_v40, 7  ;;  %v1875_v57 = vmul.f32 %v4665_v1, %v1855_v40  ;;  %v2331_v40 = vld [vmem:[#allocation31] sm:$0xff] }
 0x842   :  { %v1876_v53 = vmul.f32 %v4663_v37, %v1860_v21  ;;  %v1877_v23 = vmul.f32 %v4667_v17, %v1861_v61  ;;  %v1878_v56 = vmul.f32 %v4669_v49, %v1862_v25  ;;  %v1879_v54 = vmul.f32 %v4676_v10, %v1863_v47  ;;  %v2332_v21 = vld [vmem:[#allocation31 + $0x8] sm:$0xff] }
 0x843   :  { %v1880_v27 = vmul.f32 %v4682_v50, %v1864_v52  ;;  %v1881_v15 = vmul.f32 %v4684_v12, %v1865_v39  ;;  %v1882_v16 = vmul.f32 %v4688_v13, %v1866_v55  ;;  %v3229_v52 = vld [vmem:[#allocation5 + $0x38] sm:$0xff]  ;;  %v3091_v55 = vpack.c.bf16 %v2332_v21, %v2331_v40 }
 0x844   :  { %v2135_v58 = vrot.slane %v1876_v53, 7  ;;  %v2137_v14 = vrot.slane %v1877_v23, 6  ;;  %v2139_v37 = vrot.slane %v1878_v56, 5  ;;  %v2141_v17 = vrot.slane %v1879_v54, 4 }
 0x845   :  { %v2143_v29 = vrot.slane %v1880_v27, 3  ;;  %v2145_v1 = vrot.slane %v1881_v15, 2  ;;  %v2147_v18 = vrot.slane %v1882_v16, 1  ;;  %v2333_v27 = vld [vmem:[#allocation31 + $0x10] sm:$0xff]  ;;  %v2335_v15 = vld [vmem:[#allocation31 + $0x20] sm:$0xff] }
 0x846   :  { %v2136_v22 = vsel %vm1242_vm14, %v2135_v58, %v1875_v57  ;;  %v2334_v58 = vld [vmem:[#allocation31 + $0x18] sm:$0xff]  ;;  %v2336_v16 = vld [vmem:[#allocation31 + $0x28] sm:$0x7f] }
 0x847   :  { %v2138_v59 = vsel %vm1244_vm15, %v2137_v14, %v2136_v22  ;;  %v3094_v14 = vpack.c.bf16 %v2334_v58, %v2333_v27  ;;  %v3097_v22 = vpack.c.bf16 %v2336_v16, %v2335_v15 }
 0x848   :  { %v2140_v49 = vsel %vm1246_vm5, %v2139_v37, %v2138_v59 }
 0x849   :  { %v2142_v10 = vsel %vm1248_vm6, %v2141_v17, %v2140_v49 }
 0x84a   :  { %v2144_v50 = vsel %vm1250_vm7, %v2143_v29, %v2142_v10  ;;  %v2695_v29 = vld [vmem:[#allocation29] ss:$0 sm:$0xff] }
 0x84b   :  { %v2146_v38 = vsel %vm1252_vm8, %v2145_v1, %v2144_v50 }
 0x84c   :  { %v2148_v12 = vsel %vm1254_vm9, %v2147_v18, %v2146_v38  ;;  %v2423_v38 = vld [vmem:[#allocation34] sm:$0xff] }
 0x84d   :  { %2950 = vmatmul.mubr.f32.vlgmr.msra.gmra.mrb[20].mxu1 %v2148_v12  ;;  %v2424_v12 = vld [vmem:[#allocation34 + $0x8] sm:$0xff] }
 0x8b1   :  { %v1983_v13 = vpop.f32.mrb[16].mxu1 }
 0x8b2   :  { %v1988_v19 = vrot.slane %v1983_v13, 1  ;;  %v1989_v62 = vrot.slane %v1983_v13, 2  ;;  %v1990_v48 = vrot.slane %v1983_v13, 3  ;;  %v1991_v63 = vrot.slane %v1983_v13, 4  ;;  %v2907_v20 = vpop.f32.mrb[17].mxu1 }
 0x8b3   :  { %v1992_v3 = vrot.slane %v1983_v13, 5  ;;  %v1993_v4 = vrot.slane %v1983_v13, 6  ;;  %v1994_v60 = vrot.slane %v1983_v13, 7  ;;  %v2010_v39 = vmul.f32 %v3229_v52, %v1983_v13 }
 0x8b4   :  { %v2003_v26 = vmul.f32 %v3222_v46, %v1988_v19  ;;  %v2004_v5 = vmul.f32 %v3223_v6, %v1989_v62  ;;  %v2005_v32 = vmul.f32 %v3224_v9, %v1990_v48  ;;  %v2006_v33 = vmul.f32 %v3225_v30, %v1991_v63  ;;  %v2425_v19 = vld [vmem:[#allocation34 + $0x10] sm:$0x7f]  ;;  %v2696_v62 = vld [vmem:[#allocation32] ss:$0 sm:$0xff] }
 0x8b5   :  { %v2007_v36 = vmul.f32 %v3226_v35, %v1992_v3  ;;  %v2008_v41 = vmul.f32 %v3227_v8, %v1993_v4  ;;  %v2009_v43 = vmul.f32 %v3228_v42, %v1994_v60  ;;  %v3101_v13 = vpack.c.bf16 %v2424_v12, %v2423_v38  ;;  %v2511_v4 = vld [vmem:[#allocation37] sm:$0xff]  ;;  %v2512_v60 = vld [vmem:[#allocation37 + $0x8] sm:$0x7] }
 0x8b6   :  { %v2232_v28 = vrot.slane %v2003_v26, 7  ;;  %v2233_v7 = vrot.slane %v2004_v5, 6  ;;  %v2235_v11 = vrot.slane %v2005_v32, 5  ;;  %v2237_v45 = vrot.slane %v2006_v33, 4  ;;  %v2699_v26 = vld [vmem:[#allocation35] ss:$0 sm:$0xff] }
 0x8b7   :  { %v2239_v24 = vrot.slane %v2007_v36, 3  ;;  %v2241_v31 = vrot.slane %v2008_v41, 2  ;;  %v2243_v47 = vrot.slane %v2009_v43, 1  ;;  %v3104_v46 = vpack.c.bf16 %v2512_v60, %v2511_v4  ;;  %v2702_v32 = vld [vmem:[#allocation38] ss:$0 sm:$0xff] }
 0x8b8   :  { %v2234_v44 = vsel %vm1242_vm14, %v2233_v7, %v2232_v28  ;;  %vm2520_vm14 = vcmask 89088  }
 0x8b9   :  { %v2236_v34 = vsel %vm1244_vm15, %v2235_v11, %v2234_v44 }
 0x8ba   :  { %v2238_v61 = vsel %vm1246_vm5, %v2237_v45, %v2236_v34 }
 0x8bb   :  { %v2240_v25 = vsel %vm1248_vm6, %v2239_v24, %v2238_v61 }
 0x8bc   :  { %v2242_v53 = vsel %vm1250_vm7, %v2241_v31, %v2240_v25 }
 0x8bd   :  { %v2244_v23 = vsel %vm1252_vm8, %v2243_v47, %v2242_v53 }
 0x8be   :  { %v2245_v56 = vsel %vm1254_vm9, %v2010_v39, %v2244_v23 }
 0x8bf   :  { %2961 = vmatmul.mubr.msk.f32.vlgmr.msra.gmra.mrb[18].mxu0 %vm535_vm3, %v2245_v56  ;;  %vm3098_vm3 = vmpackc.low %vm2348_vm0, %vm4862_vm1 }
 0x8c0   :  { %3092 = vmatpush3.bf16.msra.mxu0 %v3091_v55  ;;  %2975 = vmatprep.mubr.msk.f32.mxu0 %vm3841_vm12, %v3836_v0 }
 0x8c1   :  { %3093 = vmatprep.subr.bf16.mxu0 %v3840_v51 }
 0x8c4   :  { %3095 = vmatpush3.bf16.msra.mxu0 %v3094_v14 }
 0x8c5   :  { %3096 = vmatprep.subr.bf16.mxu0 %v3840_v51 }
 0x8c8   :  { %3099 = vmatpush3.bf16.msk.msra.mxu0 %vm3098_vm3, %v3097_v22 }
 0x8c9   :  { %3100 = vmatprep.subr.bf16.mxu0 %v3840_v51 }
 0x8cb   :  { %v2123_v54 = vpop.f32.mrb[18].mxu1 }
 0x8cc   :  { %v2916_v57 = vpop.f32.mrb[19].mxu1 }
 0x920   :  { %v2216_v37 = vpop.f32.mrb[20].mxu1 }
 0x921   :  { %v2217_v59 = vadd.f32 %v2216_v37, %v2123_v54  ;;  %v2951_v17 = vpop.f32.mrb[21].mxu1 }
 0x992   :  { %v2317_v49 = vpop.f32.mrb[18].mxu0 }
 0x993   :  { %v2321_v10 = vadd.f32 %v2317_v49, %v2217_v59  ;;  %v2962_v1 = vpop.f32.mrb[19].mxu0 }
 0x995   :  { %v2329_v50 = vadd.f32 %v2695_v29, %v2321_v10 }
 0x997   :  { %v2330_v18 = vmax.f32 %v2329_v50, 0.0 }
 0x999   :  { %2976 = vmatmul.mubr.msk.f32.vlgmr.msra.gmra.mrb[20].mxu0 %vm2344_vm4, %v2330_v18 }
 0x99a   :  { %2984 = vmatprep.mubr.msk.f32.mxu0 %vm3841_vm12, %v3836_v0  ;;  %3102 = vmatpush3.bf16.msra.mxu0 %v3101_v13 }
 0x99b   :  { %2982 = vmatprep.subr.mxu0 %v3836_v0 }
 0x99e   :  { %2983 = vmatpush3.msk.msra.mxu0 %vm2348_vm0, %v2425_v19 }
 0x99f   :  { %3103 = vmatprep.subr.bf16.mxu0 %v3840_v51 }
 0xa6c   :  { %v2418_v48 = vpop.f32.mrb[20].mxu0 }
 0xa6d   :  { %v2419_v63 = vadd.f32 %v2696_v62, %v2418_v48  ;;  %v2977_v20 = vpop.f32.mrb[21].mxu0 }
 0xa6f   :  { %v2422_v3 = vmax.f32 %v2419_v63, 0.0 }
 0xa71   :  { %2985 = vmatmul.mubr.msk.f32.vlgmr.msra.gmra.mrb[22].mxu0 %vm2433_vm13, %v2422_v3 }
 0xa72   :  { %2991 = vmatprep.mubr.msk.f32.mxu0 %vm3841_vm12, %v3836_v0  ;;  %3106 = vmatpush3.bf16.msk.msra.mxu0 %vm4356_vm2, %v3104_v46 }
 0xb44   :  { %v2506_v6 = vpop.f32.mrb[22].mxu0 }
 0xb45   :  { %v2507_v5 = vadd.f32 %v2699_v26, %v2506_v6  ;;  %v2986_v51 = vpop.f32.mrb[23].mxu0 }
 0xb47   :  { %v2510_v9 = vmax.f32 %v2507_v5, 0.0 }
 0xb49   :  { %2992 = vmatmul.mubr.msk.f32.vlgmr.msra.gmra.mrb[24].mxu0 %vm2520_vm14, %v2510_v9 }
 0xc1c   :  { %v2593_v30 = vpop.f32.mrb[24].mxu0 }
 0xc1d   :  { %v2594_v33 = vadd.f32 %v2702_v32, %v2593_v30  ;;  %v2993_v35 = vpop.f32.mrb[25].mxu0 }
 0xc1f   :  { %v2597_v36 = vsub.f32 0.0, %v2594_v33 }
 0xc21   :  { %v2598_v28 = vmul.f32 1.442695, %v2597_v36 }
 0xc23   :  { %3215 = vpow2.f32 %v2598_v28 }
 0xc2d   :  { %v3216_v0 = vpop.eup %3215 }
 0xc2e   :  { %v2600_v7 = vadd.f32 1.0, %v3216_v0 }
 0xc30   :  { %3217 = vrcp.f32 %v2600_v7 }
 0xc3a   :  { %v3218_v2 = vpop.eup %3217 }
 0xc3b   :  { %2603 = vst.msk [vmem:[#allocation40] sm:$0xff] %vm1697_vm11, %v3218_v2 }
 0xc3c   :  { %3769 = shalt.err (!%p3766_p0)
}
 0xc3d   :  { %s4863_s14 = sld [smem:[#allocation66_spill]] }
 0xc43   :  { %s3770_s24 = scalar_lea.hbm %s4863_s14, 128 }
 0xc44   :  { %p3771_p1 = scmp.ne.s32.totalorder %s4863_s14, %s3770_s24  ;;  %p3774_p2 = scmp.lt.u32.totalorder %s3770_s24, %s4863_s14 }
 0xc46   :  { %p3776_p3 = pnand %p3774_p2, %p3771_p1 }
 0xc48   :  { %3779 = shalt.err (!%p3776_p3)
}
 0xc49   :  { %2613 = dma.vmem_to_hbm [thread:$0]  %s2611_s18, 128, %s4863_s14, [#allocation4]  }
 0xc4a   :  { %3806 = dma.done.wait [#allocation4], 128  }
 0xc4b   :  { %3807 = vsyncadd [#allocation4], 4294967168 }
 0xc4c   :  { %2617 = vsyncpa [#allocation3], 1 }
 0xc4d   :  { %2618 = vsyncpa [#allocation6], 1 }
 0xc4e   :  { %2619 = vsyncpa [#allocation9], 1 }
 0xc4f   :  { %2620 = vsyncpa [#allocation12], 1 }
 0xc50   :  { %2621 = vsyncpa [#allocation15], 1 }
 0xc51   :  { %2622 = vsyncpa [#allocation18], 1 }
 0xc52   :  { %2623 = vsyncpa [#allocation21], 1 }
 0xc53   :  { %2624 = vsyncpa [#allocation24], 1 }
 0xc54   :  { %2625 = vsyncpa [#allocation27], 1 }
 0xc55   :  { %2626 = vsyncpa [#allocation30], 1 }
 0xc56   :  { %2627 = vsyncpa [#allocation33], 1 }
 0xc57   :  { %2628 = vsyncpa [#allocation36], 1 }
 0xc58   :  { %2629 = vsyncpa [#allocation39], 1 }
 0xc59   :  { %2630 = vsyncpa [#allocation4], 1 }

</bundles_post_ra>
